<compile_context>
chip_gen: v5e
topology: v5e:2x2
jax: 0.10.0
libtpu: 0.0.40
codegen_flags: <defaults>
</compile_context>

<pallas_src>
import math

import jax
import jax.numpy as jnp
from jax.experimental import pallas as pl
from jax.experimental.pallas import tpu as pltpu


def _processor_kernel(
    x_ref,        # (N, D)   f32 initial node features (used only at layer 0)
    ji_ref,       # (E, N)   bf16 one-hot of edge_index[0] (source i)
    jj_ref,       # (E, N)   bf16 one-hot of edge_index[1] (dest   j)
    jjT_ref,      # (N, E)   bf16 transpose of jj one-hot
    ea_ref,       # (E, ED)  f32 edge attributes
    hp_ref,       # (D, H)   f32 head-pool matrix: P[d, h] = 1 if d // d_k == h
    hpT_ref,      # (H, D)   f32
    wqkv_ref, bqkv_ref,          # (1, D, 3D), (1, 1, 3D)  [Q*scale | K | V]
    wo_ref, bo_ref,              # (1, D, D),  (1, 1, D)
    we1_ref, be1_ref,            # (1, ED, ED),(1, 1, ED)
    we2_ref, be2_ref,            # (1, ED, H), (1, 1, H)
    g1_ref, b1_ref, g2_ref, b2_ref,   # (1, 1, D) each (LayerNorm affine)
    wf1_ref, bf1_ref,            # (1, D, F),  (1, 1, F)
    wf2_ref, bf2_ref,            # (1, F, D),  (1, 1, D)
    out_ref,      # (N, D)   f32 final output (written at last layer)
    h_ref,        # (N, D)   f32 VMEM scratch: layer carry (persists across grid)
):
    f32 = jnp.float32
    bf16 = jnp.bfloat16
    l = pl.program_id(0)
    num_layers = pl.num_programs(0)

    # ---- layer carry ----
    @pl.when(l == 0)
    def _():
        h_ref[...] = x_ref[...]

    x = h_ref[...]                      # (N, D) f32
    D = x.shape[1]

    jj = jj_ref[...]                    # (E, N) bf16
    ji = ji_ref[...]                    # (E, N) bf16
    jjT = jjT_ref[...]                  # (N, E) bf16
    P = hp_ref[...]                     # (D, H) f32
    PT = hpT_ref[...]                   # (H, D) f32

    # ---- NodeAttention: fused, pre-scaled QKV projection (one MXU matmul) ----
    qkv = jnp.dot(x, wqkv_ref[0], preferred_element_type=f32) + bqkv_ref[0]  # (N, 3D)
    q = qkv[:, :D].astype(bf16)         # Q already scaled by 1/sqrt(d_k)
    kv = qkv[:, D:].astype(bf16)        # [K | V]

    # per-edge gathers as bf16 one-hot matmuls (f32 accumulation)
    qj = jnp.dot(jj, q, preferred_element_type=f32)        # (E, D)   Q[j]
    kvi = jnp.dot(ji, kv, preferred_element_type=f32)      # (E, 2D)  [K|V][i]
    ki = kvi[:, :D]
    vi = kvi[:, D:]

    # per-head dot-product scores (scale folded into W_q)
    scores = jnp.dot(qj * ki, P, preferred_element_type=f32)      # (E, H)

    # ---- edge-bias MLP: Linear(ED,ED) -> SiLU -> Linear(ED,H) ----
    e1 = jnp.dot(ea_ref[...], we1_ref[0], preferred_element_type=f32) + be1_ref[0]
    e1 = e1 * jax.nn.sigmoid(e1)                                   # SiLU
    scores = scores + jnp.dot(e1, we2_ref[0], preferred_element_type=f32) + be2_ref[0]

    # ---- graph softmax over edges grouped by destination node j (all heads) ----
    # softmax is shift-invariant within each group, so a per-head *global* max
    # is sufficient for numerical safety (scores are bounded here); matches
    # graph_softmax up to the +1e-12 regularizer.
    m = jnp.max(scores, axis=0, keepdims=True)                     # (1, H)
    p = jnp.exp(scores - m)                                        # (E, H)
    nsum = jnp.dot(jjT, p, preferred_element_type=f32)             # (N, H) segment sums
    denom = jnp.dot(jj, nsum, preferred_element_type=f32) + 1e-12  # (E, H) gather at j
    alpha = p / denom                                              # (E, H)

    # broadcast each head weight over its d_k feature columns: (E,H) @ (H,D)
    alpha_exp = jnp.dot(alpha, PT, preferred_element_type=f32)     # (E, D)
    attn_edge = (alpha_exp * vi).astype(bf16)                      # (E, D)

    # scatter-sum onto destination nodes (bf16 one-hot matmul) + output proj
    attn_node = jnp.dot(jjT, attn_edge, preferred_element_type=f32)     # (N, D)
    attn = jnp.dot(attn_node, wo_ref[0], preferred_element_type=f32) + bo_ref[0]

    # ---- residual + LayerNorm 1 (eps=1e-5, affine) ----
    y = x + attn
    mu = jnp.mean(y, axis=-1, keepdims=True)
    var = jnp.mean((y - mu) ** 2, axis=-1, keepdims=True)
    yn = (y - mu) * jax.lax.rsqrt(var + 1e-5) * g1_ref[0] + b1_ref[0]

    # ---- FFN: Linear(D,F) -> SiLU -> Linear(F,D) ----
    f1 = jnp.dot(yn, wf1_ref[0], preferred_element_type=f32) + bf1_ref[0]
    f1 = f1 * jax.nn.sigmoid(f1)
    f2 = jnp.dot(f1, wf2_ref[0], preferred_element_type=f32) + bf2_ref[0]

    # ---- residual + LayerNorm 2 -> layer carry ----
    z = yn + f2
    mu2 = jnp.mean(z, axis=-1, keepdims=True)
    var2 = jnp.mean((z - mu2) ** 2, axis=-1, keepdims=True)
    zn = (z - mu2) * jax.lax.rsqrt(var2 + 1e-5) * g2_ref[0] + b2_ref[0]

    h_ref[...] = zn

    @pl.when(l == num_layers - 1)
    def _():
        out_ref[...] = zn


def processor_forward(h_node, edge_index, edge_attr, layers, num_heads):
    """Equivalent of Processor.forward: all GraphormerConv layers in one pallas_call."""
    N, D = h_node.shape
    E, ED = edge_attr.shape
    H = num_heads
    d_k = D // H
    F = layers[0]["wf1"].shape[1]
    L = len(layers)
    scale = 1.0 / math.sqrt(d_k)

    i_idx, j_idx = edge_index[0], edge_index[1]
    # bf16 one-hots: values 0/1 are exact; halves DMA/VMEM of the (E,N) tensors.
    ji = jax.nn.one_hot(i_idx, N, dtype=jnp.bfloat16)        # (E, N)
    jj = jax.nn.one_hot(j_idx, N, dtype=jnp.bfloat16)        # (E, N)
    jjT = jj.T                                               # (N, E)
    P = (jnp.arange(D)[:, None] // d_k
         == jnp.arange(H)[None, :]).astype(jnp.float32)      # (D, H)
    PT = P.T                                                 # (H, D)

    # fused, pre-scaled QKV weights stacked over layers
    wqkv = jnp.stack([jnp.concatenate([p["wq"] * scale, p["wk"], p["wv"]], axis=1)
                      for p in layers])                      # (L, D, 3D)
    bqkv = jnp.stack([jnp.concatenate([p["bq"] * scale, p["bk"], p["bv"]], axis=1)
                      for p in layers])                      # (L, 1, 3D)

    def stack(name):
        return jnp.stack([p[name] for p in layers])

    stacked = [
        wqkv, bqkv,
        stack("wo"), stack("bo"),
        stack("we1"), stack("be1"), stack("we2"), stack("be2"),
        stack("g1"), stack("b1"), stack("g2"), stack("b2"),
        stack("wf1"), stack("bf1"), stack("wf2"), stack("bf2"),
    ]
    resident = [h_node, ji, jj, jjT, edge_attr, P, PT]
    inputs = resident + stacked

    res_specs = [pl.BlockSpec(a.shape, lambda l: (0, 0)) for a in resident]
    w_specs = [pl.BlockSpec((1,) + a.shape[1:], lambda l: (l, 0, 0)) for a in stacked]

    flops_per_layer = (
        2 * N * D * 3 * D          # fused QKV projection
        + 2 * E * N * 3 * D        # one-hot gathers (Q[j], [K|V][i])
        + 2 * E * D * H            # per-head score reduction
        + 2 * E * ED * (ED + H)    # edge-bias MLP
        + 4 * E * N * H            # softmax segment-sum + gather
        + 2 * E * H * D            # alpha @ PT head broadcast
        + 2 * N * E * D            # scatter-sum to nodes
        + 2 * N * D * D            # output projection
        + 4 * N * D * F            # FFN
    )
    transcendentals_per_layer = E * H + E * ED + N * F
    bytes_accessed = sum(int(a.size) * a.dtype.itemsize for a in inputs) + N * D * 4
    cost = pl.CostEstimate(
        flops=int(L * flops_per_layer),
        transcendentals=int(L * transcendentals_per_layer),
        bytes_accessed=int(bytes_accessed),
    )

    return pl.pallas_call(
        _processor_kernel,
        out_shape=jax.ShapeDtypeStruct((N, D), jnp.float32),
        grid_spec=pltpu.PrefetchScalarGridSpec(
            num_scalar_prefetch=0,
            grid=(L,),
            in_specs=res_specs + w_specs,
            out_specs=pl.BlockSpec((N, D), lambda l: (0, 0)),
            scratch_shapes=[pltpu.VMEM((N, D), jnp.float32)],
        ),
        compiler_params=pltpu.CompilerParams(
            dimension_semantics=("arbitrary",),        # sequential layer carry
            vmem_limit_bytes=32 * 1024 * 1024,
        ),
        cost_estimate=cost,
    )(*inputs)


def _init_linear(key, d_in, d_out):
    kw, kb = jax.random.split(key)
    lim = 1.0 / math.sqrt(d_in)
    w = jax.random.uniform(kw, (d_in, d_out), jnp.float32, -lim, lim)
    b = jax.random.uniform(kb, (1, d_out), jnp.float32, -lim, lim)
    return w, b


def init_graphormer_conv(key, dim, num_heads, ff_dim, edge_dim):
    ks = jax.random.split(key, 8)
    p = {}
    p["wq"], p["bq"] = _init_linear(ks[0], dim, dim)
    p["wk"], p["bk"] = _init_linear(ks[1], dim, dim)
    p["wv"], p["bv"] = _init_linear(ks[2], dim, dim)
    p["wo"], p["bo"] = _init_linear(ks[3], dim, dim)
    p["we1"], p["be1"] = _init_linear(ks[4], edge_dim, edge_dim)
    p["we2"], p["be2"] = _init_linear(ks[5], edge_dim, num_heads)
    p["g1"] = jnp.ones((1, dim), jnp.float32)
    p["b1"] = jnp.zeros((1, dim), jnp.float32)
    p["g2"] = jnp.ones((1, dim), jnp.float32)
    p["b2"] = jnp.zeros((1, dim), jnp.float32)
    p["wf1"], p["bf1"] = _init_linear(ks[6], dim, ff_dim)
    p["wf2"], p["bf2"] = _init_linear(ks[7], ff_dim, dim)
    return p


if __name__ == "__main__":
    # small shapes consistent with the module
    NUM_CONVS = 2
    NODE_DIM = 32
    NUM_HEADS = 4
    FF_DIM = 64
    EDGE_DIM = 8
    NUM_NODES = 16
    NUM_EDGES = 32

    key = jax.random.PRNGKey(0)
    k_x, k_ei, k_ea, k_w = jax.random.split(key, 4)

    h_node = jax.random.normal(k_x, (NUM_NODES, NODE_DIM), jnp.float32)
    edge_index = jax.random.randint(k_ei, (2, NUM_EDGES), 0, NUM_NODES)
    edge_attr = jax.random.normal(k_ea, (NUM_EDGES, EDGE_DIM), jnp.float32)

    layer_keys = jax.random.split(k_w, NUM_CONVS)
    layers = [init_graphormer_conv(k, NODE_DIM, NUM_HEADS, FF_DIM, EDGE_DIM)
              for k in layer_keys]

    out = processor_forward(h_node, edge_index, edge_attr, layers, NUM_HEADS)
    out = jax.block_until_ready(out)

    assert out.shape == (NUM_NODES, NODE_DIM)
    assert bool(jnp.all(jnp.isfinite(out)))
    print("KERNEL_OK")
</pallas_src>

<mosaic_0001>
module attributes {stable_mosaic.version = 11 : i64} {
  func.func @_processor_kernel(%arg0: i32, %arg1: memref<16x32xf32, #tpu.memory_space<vmem>>, %arg2: memref<32x16xbf16, #tpu.memory_space<vmem>>, %arg3: memref<32x16xbf16, #tpu.memory_space<vmem>>, %arg4: memref<16x32xbf16, #tpu.memory_space<vmem>>, %arg5: memref<32x8xf32, #tpu.memory_space<vmem>>, %arg6: memref<32x4xf32, #tpu.memory_space<vmem>>, %arg7: memref<4x32xf32, #tpu.memory_space<vmem>>, %arg8: memref<1x32x96xf32, #tpu.memory_space<vmem>>, %arg9: memref<1x1x96xf32, #tpu.memory_space<vmem>>, %arg10: memref<1x32x32xf32, #tpu.memory_space<vmem>>, %arg11: memref<1x1x32xf32, #tpu.memory_space<vmem>>, %arg12: memref<1x8x8xf32, #tpu.memory_space<vmem>>, %arg13: memref<1x1x8xf32, #tpu.memory_space<vmem>>, %arg14: memref<1x8x4xf32, #tpu.memory_space<vmem>>, %arg15: memref<1x1x4xf32, #tpu.memory_space<vmem>>, %arg16: memref<1x1x32xf32, #tpu.memory_space<vmem>>, %arg17: memref<1x1x32xf32, #tpu.memory_space<vmem>>, %arg18: memref<1x1x32xf32, #tpu.memory_space<vmem>>, %arg19: memref<1x1x32xf32, #tpu.memory_space<vmem>>, %arg20: memref<1x32x64xf32, #tpu.memory_space<vmem>>, %arg21: memref<1x1x64xf32, #tpu.memory_space<vmem>>, %arg22: memref<1x64x32xf32, #tpu.memory_space<vmem>>, %arg23: memref<1x1x32xf32, #tpu.memory_space<vmem>>, %arg24: memref<16x32xf32, #tpu.memory_space<vmem>>, %arg25: memref<16x32xf32, #tpu.memory_space<vmem>>) attributes {dimension_semantics = [#tpu.dimension_semantics<arbitrary>], iteration_bounds = array<i64: 2>, scalar_prefetch = 0 : i64, scratch_operands = 1 : i64, tpu.core_type = #tpu.core_type<tc>, window_params = [{pipeline_mode = #tpu.pipeline_mode<synchronous>, transform_indices = @transform_0, window_bounds = array<i64: 16, 32>}, {pipeline_mode = #tpu.pipeline_mode<synchronous>, transform_indices = @transform_1, window_bounds = array<i64: 32, 16>}, {pipeline_mode = #tpu.pipeline_mode<synchronous>, transform_indices = @transform_2, window_bounds = array<i64: 32, 16>}, {pipeline_mode = #tpu.pipeline_mode<synchronous>, transform_indices = @transform_3, window_bounds = array<i64: 16, 32>}, {pipeline_mode = #tpu.pipeline_mode<synchronous>, transform_indices = @transform_4, window_bounds = array<i64: 32, 8>}, {pipeline_mode = #tpu.pipeline_mode<synchronous>, transform_indices = @transform_5, window_bounds = array<i64: 32, 4>}, {pipeline_mode = #tpu.pipeline_mode<synchronous>, transform_indices = @transform_6, window_bounds = array<i64: 4, 32>}, {transform_indices = @transform_7, window_bounds = array<i64: 1, 32, 96>}, {transform_indices = @transform_8, window_bounds = array<i64: 1, 1, 96>}, {transform_indices = @transform_9, window_bounds = array<i64: 1, 32, 32>}, {transform_indices = @transform_10, window_bounds = array<i64: 1, 1, 32>}, {transform_indices = @transform_11, window_bounds = array<i64: 1, 8, 8>}, {transform_indices = @transform_12, window_bounds = array<i64: 1, 1, 8>}, {transform_indices = @transform_13, window_bounds = array<i64: 1, 8, 4>}, {transform_indices = @transform_14, window_bounds = array<i64: 1, 1, 4>}, {transform_indices = @transform_15, window_bounds = array<i64: 1, 1, 32>}, {transform_indices = @transform_16, window_bounds = array<i64: 1, 1, 32>}, {transform_indices = @transform_17, window_bounds = array<i64: 1, 1, 32>}, {transform_indices = @transform_18, window_bounds = array<i64: 1, 1, 32>}, {transform_indices = @transform_19, window_bounds = array<i64: 1, 32, 64>}, {transform_indices = @transform_20, window_bounds = array<i64: 1, 1, 64>}, {transform_indices = @transform_21, window_bounds = array<i64: 1, 64, 32>}, {transform_indices = @transform_22, window_bounds = array<i64: 1, 1, 32>}, {pipeline_mode = #tpu.pipeline_mode<synchronous>, transform_indices = @transform_23, window_bounds = array<i64: 16, 32>}]} {
    %c0_i32 = arith.constant 0 : i32
    %0 = arith.cmpi eq, %arg0, %c0_i32 : i32
    %1 = arith.extui %0 : i1 to i32
    %c0_i32_0 = arith.constant 0 : i32
    %2 = arith.cmpi ne, %1, %c0_i32_0 : i32
    scf.if %2 {
      %c0_91 = arith.constant 0 : index
      %c0_92 = arith.constant 0 : index
      %147 = vector.load %arg1[%c0_91, %c0_92] : memref<16x32xf32, #tpu.memory_space<vmem>>, vector<16x32xf32>
      %c0_93 = arith.constant 0 : index
      %c0_94 = arith.constant 0 : index
      %148 = vector.load %arg25[%c0_93, %c0_94] : memref<16x32xf32, #tpu.memory_space<vmem>>, vector<16x32xf32>
      tpu.vector_store %arg25[%c0_93, %c0_94], %147 {strides = array<i32>} : memref<16x32xf32, #tpu.memory_space<vmem>>, vector<16x32xf32>,
    } else {
    }
    %c0 = arith.constant 0 : index
    %c0_1 = arith.constant 0 : index
    %3 = vector.load %arg25[%c0, %c0_1] : memref<16x32xf32, #tpu.memory_space<vmem>>, vector<16x32xf32>
    %c0_2 = arith.constant 0 : index
    %c0_3 = arith.constant 0 : index
    %4 = vector.load %arg3[%c0_2, %c0_3] : memref<32x16xbf16, #tpu.memory_space<vmem>>, vector<32x16xbf16>
    %c0_4 = arith.constant 0 : index
    %c0_5 = arith.constant 0 : index
    %5 = vector.load %arg2[%c0_4, %c0_5] : memref<32x16xbf16, #tpu.memory_space<vmem>>, vector<32x16xbf16>
    %c0_6 = arith.constant 0 : index
    %c0_7 = arith.constant 0 : index
    %6 = vector.load %arg4[%c0_6, %c0_7] : memref<16x32xbf16, #tpu.memory_space<vmem>>, vector<16x32xbf16>
    %c0_8 = arith.constant 0 : index
    %c0_9 = arith.constant 0 : index
    %7 = vector.load %arg6[%c0_8, %c0_9] : memref<32x4xf32, #tpu.memory_space<vmem>>, vector<32x4xf32>
    %c0_10 = arith.constant 0 : index
    %c0_11 = arith.constant 0 : index
    %8 = vector.load %arg7[%c0_10, %c0_11] : memref<4x32xf32, #tpu.memory_space<vmem>>, vector<4x32xf32>
    %c0_12 = arith.constant 0 : index
    %c0_13 = arith.constant 0 : index
    %c0_14 = arith.constant 0 : index
    %9 = vector.load %arg8[%c0_12, %c0_13, %c0_14] : memref<1x32x96xf32, #tpu.memory_space<vmem>>, vector<1x32x96xf32>
    %10 = vector.shape_cast %9 : vector<1x32x96xf32> to vector<32x96xf32>
    %cst = arith.constant dense<0.000000e+00> : vector<16x96xf32>
    %11 = tpu.matmul %3, %10, %cst {dimension_numbers = #tpu.dot_dimension_numbers<[1], [0], [0], [1], [0, 0, 1, 1], [], []>} : vector<16x32xf32>, vector<32x96xf32>, vector<16x96xf32> -> vector<16x96xf32>
    %c0_15 = arith.constant 0 : index
    %c0_16 = arith.constant 0 : index
    %c0_17 = arith.constant 0 : index
    %12 = vector.load %arg9[%c0_15, %c0_16, %c0_17] : memref<1x1x96xf32, #tpu.memory_space<vmem>>, vector<1x1x96xf32>
    %13 = vector.shape_cast %12 : vector<1x1x96xf32> to vector<1x96xf32>
    %14 = vector.broadcast %13 : vector<1x96xf32> to vector<16x96xf32>
    %15 = arith.addf %11, %14 : vector<16x96xf32>
    %16 = vector.extract_strided_slice %15 {offsets = [0, 0], sizes = [16, 32], strides = [1, 1]} : vector<16x96xf32> to vector<16x32xf32>
    %17 = arith.truncf %16 : vector<16x32xf32> to vector<16x32xbf16>
    %18 = vector.extract_strided_slice %15 {offsets = [0, 32], sizes = [16, 64], strides = [1, 1]} : vector<16x96xf32> to vector<16x64xf32>
    %19 = arith.truncf %18 : vector<16x64xf32> to vector<16x64xbf16>
    %cst_18 = arith.constant dense<0.000000e+00> : vector<32x32xf32>
    %20 = tpu.matmul %4, %17, %cst_18 {dimension_numbers = #tpu.dot_dimension_numbers<[1], [0], [0], [1], [0, 0, 1, 1], [], []>} : vector<32x16xbf16>, vector<16x32xbf16>, vector<32x32xf32> -> vector<32x32xf32>
    %cst_19 = arith.constant dense<0.000000e+00> : vector<32x64xf32>
    %21 = tpu.matmul %5, %19, %cst_19 {dimension_numbers = #tpu.dot_dimension_numbers<[1], [0], [0], [1], [0, 0, 1, 1], [], []>} : vector<32x16xbf16>, vector<16x64xbf16>, vector<32x64xf32> -> vector<32x64xf32>
    %22 = vector.extract_strided_slice %21 {offsets = [0, 0], sizes = [32, 32], strides = [1, 1]} : vector<32x64xf32> to vector<32x32xf32>
    %23 = vector.extract_strided_slice %21 {offsets = [0, 32], sizes = [32, 32], strides = [1, 1]} : vector<32x64xf32> to vector<32x32xf32>
    %24 = arith.mulf %20, %22 : vector<32x32xf32>
    %cst_20 = arith.constant dense<0.000000e+00> : vector<32x4xf32>
    %25 = tpu.matmul %24, %7, %cst_20 {dimension_numbers = #tpu.dot_dimension_numbers<[1], [0], [0], [1], [0, 0, 1, 1], [], []>} : vector<32x32xf32>, vector<32x4xf32>, vector<32x4xf32> -> vector<32x4xf32>
    %c0_21 = arith.constant 0 : index
    %c0_22 = arith.constant 0 : index
    %26 = vector.load %arg5[%c0_21, %c0_22] : memref<32x8xf32, #tpu.memory_space<vmem>>, vector<32x8xf32>
    %c0_23 = arith.constant 0 : index
    %c0_24 = arith.constant 0 : index
    %c0_25 = arith.constant 0 : index
    %27 = vector.load %arg12[%c0_23, %c0_24, %c0_25] : memref<1x8x8xf32, #tpu.memory_space<vmem>>, vector<1x8x8xf32>
    %28 = vector.shape_cast %27 : vector<1x8x8xf32> to vector<8x8xf32>
    %cst_26 = arith.constant dense<0.000000e+00> : vector<32x8xf32>
    %29 = tpu.matmul %26, %28, %cst_26 {dimension_numbers = #tpu.dot_dimension_numbers<[1], [0], [0], [1], [0, 0, 1, 1], [], []>} : vector<32x8xf32>, vector<8x8xf32>, vector<32x8xf32> -> vector<32x8xf32>
    %c0_27 = arith.constant 0 : index
    %c0_28 = arith.constant 0 : index
    %c0_29 = arith.constant 0 : index
    %30 = vector.load %arg13[%c0_27, %c0_28, %c0_29] : memref<1x1x8xf32, #tpu.memory_space<vmem>>, vector<1x1x8xf32>
    %31 = vector.shape_cast %30 : vector<1x1x8xf32> to vector<1x8xf32>
    %32 = vector.broadcast %31 : vector<1x8xf32> to vector<32x8xf32>
    %33 = arith.addf %29, %32 : vector<32x8xf32>
    %34 = arith.negf %33 : vector<32x8xf32>
    %35 = math.exp %34 : vector<32x8xf32>
    %cst_30 = arith.constant 1.000000e+00 : f32
    %36 = vector.broadcast %cst_30 : f32 to vector<32x8xf32>
    %37 = arith.addf %36, %35 : vector<32x8xf32>
    %38 = arith.divf %36, %37 : vector<32x8xf32>
    %39 = arith.mulf %33, %38 : vector<32x8xf32>
    %c0_31 = arith.constant 0 : index
    %c0_32 = arith.constant 0 : index
    %c0_33 = arith.constant 0 : index
    %40 = vector.load %arg14[%c0_31, %c0_32, %c0_33] : memref<1x8x4xf32, #tpu.memory_space<vmem>>, vector<1x8x4xf32>
    %41 = vector.shape_cast %40 : vector<1x8x4xf32> to vector<8x4xf32>
    %cst_34 = arith.constant dense<0.000000e+00> : vector<32x4xf32>
    %42 = tpu.matmul %39, %41, %cst_34 {dimension_numbers = #tpu.dot_dimension_numbers<[1], [0], [0], [1], [0, 0, 1, 1], [], []>} : vector<32x8xf32>, vector<8x4xf32>, vector<32x4xf32> -> vector<32x4xf32>
    %43 = arith.addf %25, %42 : vector<32x4xf32>
    %c0_35 = arith.constant 0 : index
    %c0_36 = arith.constant 0 : index
    %c0_37 = arith.constant 0 : index
    %44 = vector.load %arg15[%c0_35, %c0_36, %c0_37] : memref<1x1x4xf32, #tpu.memory_space<vmem>>, vector<1x1x4xf32>
    %45 = vector.shape_cast %44 : vector<1x1x4xf32> to vector<1x4xf32>
    %46 = vector.broadcast %45 : vector<1x4xf32> to vector<32x4xf32>
    %47 = arith.addf %43, %46 : vector<32x4xf32>
    %cst_38 = arith.constant dense<0xFF800000> : vector<4xf32>
    %48 = vector.multi_reduction <maximumf>, %47, %cst_38 [0] : vector<32x4xf32> to vector<4xf32>
    %49 = vector.shape_cast %48 : vector<4xf32> to vector<1x4xf32>
    %50 = vector.broadcast %49 : vector<1x4xf32> to vector<32x4xf32>
    %51 = arith.subf %47, %50 : vector<32x4xf32>
    %52 = math.exp %51 : vector<32x4xf32>
    %cst_39 = arith.constant dense<0.000000e+00> : vector<16x4xf32>
    %53 = tpu.matmul %6, %52, %cst_39 {dimension_numbers = #tpu.dot_dimension_numbers<[1], [0], [0], [1], [0, 0, 1, 1], [], []>} : vector<16x32xbf16>, vector<32x4xf32>, vector<16x4xf32> -> vector<16x4xf32>
    %cst_40 = arith.constant dense<0.000000e+00> : vector<32x4xf32>
    %54 = tpu.matmul %4, %53, %cst_40 {dimension_numbers = #tpu.dot_dimension_numbers<[1], [0], [0], [1], [0, 0, 1, 1], [], []>} : vector<32x16xbf16>, vector<16x4xf32>, vector<32x4xf32> -> vector<32x4xf32>
    %cst_41 = arith.constant 9.99999996E-13 : f32
    %55 = vector.broadcast %cst_41 : f32 to vector<32x4xf32>
    %56 = arith.addf %54, %55 : vector<32x4xf32>
    %57 = arith.divf %52, %56 : vector<32x4xf32>
    %cst_42 = arith.constant dense<0.000000e+00> : vector<32x32xf32>
    %58 = tpu.matmul %57, %8, %cst_42 {dimension_numbers = #tpu.dot_dimension_numbers<[1], [0], [0], [1], [0, 0, 1, 1], [], []>} : vector<32x4xf32>, vector<4x32xf32>, vector<32x32xf32> -> vector<32x32xf32>
    %59 = arith.mulf %58, %23 : vector<32x32xf32>
    %60 = arith.truncf %59 : vector<32x32xf32> to vector<32x32xbf16>
    %cst_43 = arith.constant dense<0.000000e+00> : vector<16x32xf32>
    %61 = tpu.matmul %6, %60, %cst_43 {dimension_numbers = #tpu.dot_dimension_numbers<[1], [0], [0], [1], [0, 0, 1, 1], [], []>} : vector<16x32xbf16>, vector<32x32xbf16>, vector<16x32xf32> -> vector<16x32xf32>
    %c0_44 = arith.constant 0 : index
    %c0_45 = arith.constant 0 : index
    %c0_46 = arith.constant 0 : index
    %62 = vector.load %arg10[%c0_44, %c0_45, %c0_46] : memref<1x32x32xf32, #tpu.memory_space<vmem>>, vector<1x32x32xf32>
    %63 = vector.shape_cast %62 : vector<1x32x32xf32> to vector<32x32xf32>
    %cst_47 = arith.constant dense<0.000000e+00> : vector<16x32xf32>
    %64 = tpu.matmul %61, %63, %cst_47 {dimension_numbers = #tpu.dot_dimension_numbers<[1], [0], [0], [1], [0, 0, 1, 1], [], []>} : vector<16x32xf32>, vector<32x32xf32>, vector<16x32xf32> -> vector<16x32xf32>
    %c0_48 = arith.constant 0 : index
    %c0_49 = arith.constant 0 : index
    %c0_50 = arith.constant 0 : index
    %65 = vector.load %arg11[%c0_48, %c0_49, %c0_50] : memref<1x1x32xf32, #tpu.memory_space<vmem>>, vector<1x1x32xf32>
    %66 = vector.shape_cast %65 : vector<1x1x32xf32> to vector<1x32xf32>
    %67 = vector.broadcast %66 : vector<1x32xf32> to vector<16x32xf32>
    %68 = arith.addf %64, %67 : vector<16x32xf32>
    %69 = arith.addf %3, %68 : vector<16x32xf32>
    %cst_51 = arith.constant dense<0.000000e+00> : vector<16xf32>
    %70 = vector.multi_reduction <add>, %69, %cst_51 [1] : vector<16x32xf32> to vector<16xf32>
    %71 = vector.shape_cast %70 : vector<16xf32> to vector<16x1xf32>
    %cst_52 = arith.constant 3.200000e+01 : f32
    %72 = vector.broadcast %cst_52 : f32 to vector<16x1xf32>
    %73 = arith.divf %71, %72 : vector<16x1xf32>
    %74 = vector.broadcast %73 : vector<16x1xf32> to vector<16x32xf32>
    %75 = arith.subf %69, %74 : vector<16x32xf32>
    %76 = arith.mulf %75, %75 : vector<16x32xf32>
    %cst_53 = arith.constant dense<0.000000e+00> : vector<16xf32>
    %77 = vector.multi_reduction <add>, %76, %cst_53 [1] : vector<16x32xf32> to vector<16xf32>
    %78 = vector.shape_cast %77 : vector<16xf32> to vector<16x1xf32>
    %cst_54 = arith.constant 3.200000e+01 : f32
    %79 = vector.broadcast %cst_54 : f32 to vector<16x1xf32>
    %80 = arith.divf %78, %79 : vector<16x1xf32>
    %81 = vector.broadcast %73 : vector<16x1xf32> to vector<16x32xf32>
    %82 = arith.subf %69, %81 : vector<16x32xf32>
    %cst_55 = arith.constant 9.99999974E-6 : f32
    %83 = vector.broadcast %cst_55 : f32 to vector<16x1xf32>
    %84 = arith.addf %80, %83 : vector<16x1xf32>
    %85 = math.rsqrt %84 : vector<16x1xf32>
    %86 = vector.broadcast %85 : vector<16x1xf32> to vector<16x32xf32>
    %87 = arith.mulf %82, %86 : vector<16x32xf32>
    %c0_56 = arith.constant 0 : index
    %c0_57 = arith.constant 0 : index
    %c0_58 = arith.constant 0 : index
    %88 = vector.load %arg16[%c0_56, %c0_57, %c0_58] : memref<1x1x32xf32, #tpu.memory_space<vmem>>, vector<1x1x32xf32>
    %89 = vector.shape_cast %88 : vector<1x1x32xf32> to vector<1x32xf32>
    %90 = vector.broadcast %89 : vector<1x32xf32> to vector<16x32xf32>
    %91 = arith.mulf %87, %90 : vector<16x32xf32>
    %c0_59 = arith.constant 0 : index
    %c0_60 = arith.constant 0 : index
    %c0_61 = arith.constant 0 : index
    %92 = vector.load %arg17[%c0_59, %c0_60, %c0_61] : memref<1x1x32xf32, #tpu.memory_space<vmem>>, vector<1x1x32xf32>
    %93 = vector.shape_cast %92 : vector<1x1x32xf32> to vector<1x32xf32>
    %94 = vector.broadcast %93 : vector<1x32xf32> to vector<16x32xf32>
    %95 = arith.addf %91, %94 : vector<16x32xf32>
    %c0_62 = arith.constant 0 : index
    %c0_63 = arith.constant 0 : index
    %c0_64 = arith.constant 0 : index
    %96 = vector.load %arg20[%c0_62, %c0_63, %c0_64] : memref<1x32x64xf32, #tpu.memory_space<vmem>>, vector<1x32x64xf32>
    %97 = vector.shape_cast %96 : vector<1x32x64xf32> to vector<32x64xf32>
    %cst_65 = arith.constant dense<0.000000e+00> : vector<16x64xf32>
    %98 = tpu.matmul %95, %97, %cst_65 {dimension_numbers = #tpu.dot_dimension_numbers<[1], [0], [0], [1], [0, 0, 1, 1], [], []>} : vector<16x32xf32>, vector<32x64xf32>, vector<16x64xf32> -> vector<16x64xf32>
    %c0_66 = arith.constant 0 : index
    %c0_67 = arith.constant 0 : index
    %c0_68 = arith.constant 0 : index
    %99 = vector.load %arg21[%c0_66, %c0_67, %c0_68] : memref<1x1x64xf32, #tpu.memory_space<vmem>>, vector<1x1x64xf32>
    %100 = vector.shape_cast %99 : vector<1x1x64xf32> to vector<1x64xf32>
    %101 = vector.broadcast %100 : vector<1x64xf32> to vector<16x64xf32>
    %102 = arith.addf %98, %101 : vector<16x64xf32>
    %103 = arith.negf %102 : vector<16x64xf32>
    %104 = math.exp %103 : vector<16x64xf32>
    %cst_69 = arith.constant 1.000000e+00 : f32
    %105 = vector.broadcast %cst_69 : f32 to vector<16x64xf32>
    %106 = arith.addf %105, %104 : vector<16x64xf32>
    %107 = arith.divf %105, %106 : vector<16x64xf32>
    %108 = arith.mulf %102, %107 : vector<16x64xf32>
    %c0_70 = arith.constant 0 : index
    %c0_71 = arith.constant 0 : index
    %c0_72 = arith.constant 0 : index
    %109 = vector.load %arg22[%c0_70, %c0_71, %c0_72] : memref<1x64x32xf32, #tpu.memory_space<vmem>>, vector<1x64x32xf32>
    %110 = vector.shape_cast %109 : vector<1x64x32xf32> to vector<64x32xf32>
    %cst_73 = arith.constant dense<0.000000e+00> : vector<16x32xf32>
    %111 = tpu.matmul %108, %110, %cst_73 {dimension_numbers = #tpu.dot_dimension_numbers<[1], [0], [0], [1], [0, 0, 1, 1], [], []>} : vector<16x64xf32>, vector<64x32xf32>, vector<16x32xf32> -> vector<16x32xf32>
    %c0_74 = arith.constant 0 : index
    %c0_75 = arith.constant 0 : index
    %c0_76 = arith.constant 0 : index
    %112 = vector.load %arg23[%c0_74, %c0_75, %c0_76] : memref<1x1x32xf32, #tpu.memory_space<vmem>>, vector<1x1x32xf32>
    %113 = vector.shape_cast %112 : vector<1x1x32xf32> to vector<1x32xf32>
    %114 = vector.broadcast %113 : vector<1x32xf32> to vector<16x32xf32>
    %115 = arith.addf %111, %114 : vector<16x32xf32>
    %116 = arith.addf %95, %115 : vector<16x32xf32>
    %cst_77 = arith.constant dense<0.000000e+00> : vector<16xf32>
    %117 = vector.multi_reduction <add>, %116, %cst_77 [1] : vector<16x32xf32> to vector<16xf32>
    %118 = vector.shape_cast %117 : vector<16xf32> to vector<16x1xf32>
    %cst_78 = arith.constant 3.200000e+01 : f32
    %119 = vector.broadcast %cst_78 : f32 to vector<16x1xf32>
    %120 = arith.divf %118, %119 : vector<16x1xf32>
    %121 = vector.broadcast %120 : vector<16x1xf32> to vector<16x32xf32>
    %122 = arith.subf %116, %121 : vector<16x32xf32>
    %123 = arith.mulf %122, %122 : vector<16x32xf32>
    %cst_79 = arith.constant dense<0.000000e+00> : vector<16xf32>
    %124 = vector.multi_reduction <add>, %123, %cst_79 [1] : vector<16x32xf32> to vector<16xf32>
    %125 = vector.shape_cast %124 : vector<16xf32> to vector<16x1xf32>
    %cst_80 = arith.constant 3.200000e+01 : f32
    %126 = vector.broadcast %cst_80 : f32 to vector<16x1xf32>
    %127 = arith.divf %125, %126 : vector<16x1xf32>
    %128 = vector.broadcast %120 : vector<16x1xf32> to vector<16x32xf32>
    %129 = arith.subf %116, %128 : vector<16x32xf32>
    %cst_81 = arith.constant 9.99999974E-6 : f32
    %130 = vector.broadcast %cst_81 : f32 to vector<16x1xf32>
    %131 = arith.addf %127, %130 : vector<16x1xf32>
    %132 = math.rsqrt %131 : vector<16x1xf32>
    %133 = vector.broadcast %132 : vector<16x1xf32> to vector<16x32xf32>
    %134 = arith.mulf %129, %133 : vector<16x32xf32>
    %c0_82 = arith.constant 0 : index
    %c0_83 = arith.constant 0 : index
    %c0_84 = arith.constant 0 : index
    %135 = vector.load %arg18[%c0_82, %c0_83, %c0_84] : memref<1x1x32xf32, #tpu.memory_space<vmem>>, vector<1x1x32xf32>
    %136 = vector.shape_cast %135 : vector<1x1x32xf32> to vector<1x32xf32>
    %137 = vector.broadcast %136 : vector<1x32xf32> to vector<16x32xf32>
    %138 = arith.mulf %134, %137 : vector<16x32xf32>
    %c0_85 = arith.constant 0 : index
    %c0_86 = arith.constant 0 : index
    %c0_87 = arith.constant 0 : index
    %139 = vector.load %arg19[%c0_85, %c0_86, %c0_87] : memref<1x1x32xf32, #tpu.memory_space<vmem>>, vector<1x1x32xf32>
    %140 = vector.shape_cast %139 : vector<1x1x32xf32> to vector<1x32xf32>
    %141 = vector.broadcast %140 : vector<1x32xf32> to vector<16x32xf32>
    %142 = arith.addf %138, %141 : vector<16x32xf32>
    %c0_88 = arith.constant 0 : index
    %c0_89 = arith.constant 0 : index
    %143 = vector.load %arg25[%c0_88, %c0_89] : memref<16x32xf32, #tpu.memory_space<vmem>>, vector<16x32xf32>
    tpu.vector_store %arg25[%c0_88, %c0_89], %142 {strides = array<i32>} : memref<16x32xf32, #tpu.memory_space<vmem>>, vector<16x32xf32>,
    %c1_i32 = arith.constant 1 : i32
    %144 = arith.cmpi eq, %arg0, %c1_i32 : i32
    %145 = arith.extui %144 : i1 to i32
    %c0_i32_90 = arith.constant 0 : i32
    %146 = arith.cmpi ne, %145, %c0_i32_90 : i32
    scf.if %146 {
      %c0_91 = arith.constant 0 : index
      %c0_92 = arith.constant 0 : index
      %147 = vector.load %arg24[%c0_91, %c0_92] : memref<16x32xf32, #tpu.memory_space<vmem>>, vector<16x32xf32>
      tpu.vector_store %arg24[%c0_91, %c0_92], %142 {strides = array<i32>} : memref<16x32xf32, #tpu.memory_space<vmem>>, vector<16x32xf32>,
    } else {
    }
    return
  }
  func.func @transform_0(%arg0: i32) -> (i32, i32) {
    %c0_i32 = arith.constant 0 : i32
    %c0_i32_0 = arith.constant 0 : i32
    %c0_i32_1 = arith.constant 0 : i32
    return %c0_i32, %c0_i32_0 : i32, i32
  }
  func.func @transform_1(%arg0: i32) -> (i32, i32) {
    %c0_i32 = arith.constant 0 : i32
    %c0_i32_0 = arith.constant 0 : i32
    %c0_i32_1 = arith.constant 0 : i32
    return %c0_i32, %c0_i32_0 : i32, i32
  }
  func.func @transform_2(%arg0: i32) -> (i32, i32) {
    %c0_i32 = arith.constant 0 : i32
    %c0_i32_0 = arith.constant 0 : i32
    %c0_i32_1 = arith.constant 0 : i32
    return %c0_i32, %c0_i32_0 : i32, i32
  }
  func.func @transform_3(%arg0: i32) -> (i32, i32) {
    %c0_i32 = arith.constant 0 : i32
    %c0_i32_0 = arith.constant 0 : i32
    %c0_i32_1 = arith.constant 0 : i32
    return %c0_i32, %c0_i32_0 : i32, i32
  }
  func.func @transform_4(%arg0: i32) -> (i32, i32) {
    %c0_i32 = arith.constant 0 : i32
    %c0_i32_0 = arith.constant 0 : i32
    %c0_i32_1 = arith.constant 0 : i32
    return %c0_i32, %c0_i32_0 : i32, i32
  }
  func.func @transform_5(%arg0: i32) -> (i32, i32) {
    %c0_i32 = arith.constant 0 : i32
    %c0_i32_0 = arith.constant 0 : i32
    %c0_i32_1 = arith.constant 0 : i32
    return %c0_i32, %c0_i32_0 : i32, i32
  }
  func.func @transform_6(%arg0: i32) -> (i32, i32) {
    %c0_i32 = arith.constant 0 : i32
    %c0_i32_0 = arith.constant 0 : i32
    %c0_i32_1 = arith.constant 0 : i32
    return %c0_i32, %c0_i32_0 : i32, i32
  }
  func.func @transform_7(%arg0: i32) -> (i32, i32, i32) {
    %c0_i32 = arith.constant 0 : i32
    %c0_i32_0 = arith.constant 0 : i32
    %c0_i32_1 = arith.constant 0 : i32
    return %arg0, %c0_i32, %c0_i32_0 : i32, i32, i32
  }
  func.func @transform_8(%arg0: i32) -> (i32, i32, i32) {
    %c0_i32 = arith.constant 0 : i32
    %c0_i32_0 = arith.constant 0 : i32
    %c0_i32_1 = arith.constant 0 : i32
    return %arg0, %c0_i32, %c0_i32_0 : i32, i32, i32
  }
  func.func @transform_9(%arg0: i32) -> (i32, i32, i32) {
    %c0_i32 = arith.constant 0 : i32
    %c0_i32_0 = arith.constant 0 : i32
    %c0_i32_1 = arith.constant 0 : i32
    return %arg0, %c0_i32, %c0_i32_0 : i32, i32, i32
  }
  func.func @transform_10(%arg0: i32) -> (i32, i32, i32) {
    %c0_i32 = arith.constant 0 : i32
    %c0_i32_0 = arith.constant 0 : i32
    %c0_i32_1 = arith.constant 0 : i32
    return %arg0, %c0_i32, %c0_i32_0 : i32, i32, i32
  }
  func.func @transform_11(%arg0: i32) -> (i32, i32, i32) {
    %c0_i32 = arith.constant 0 : i32
    %c0_i32_0 = arith.constant 0 : i32
    %c0_i32_1 = arith.constant 0 : i32
    return %arg0, %c0_i32, %c0_i32_0 : i32, i32, i32
  }
  func.func @transform_12(%arg0: i32) -> (i32, i32, i32) {
    %c0_i32 = arith.constant 0 : i32
    %c0_i32_0 = arith.constant 0 : i32
    %c0_i32_1 = arith.constant 0 : i32
    return %arg0, %c0_i32, %c0_i32_0 : i32, i32, i32
  }
  func.func @transform_13(%arg0: i32) -> (i32, i32, i32) {
    %c0_i32 = arith.constant 0 : i32
    %c0_i32_0 = arith.constant 0 : i32
    %c0_i32_1 = arith.constant 0 : i32
    return %arg0, %c0_i32, %c0_i32_0 : i32, i32, i32
  }
  func.func @transform_14(%arg0: i32) -> (i32, i32, i32) {
    %c0_i32 = arith.constant 0 : i32
    %c0_i32_0 = arith.constant 0 : i32
    %c0_i32_1 = arith.constant 0 : i32
    return %arg0, %c0_i32, %c0_i32_0 : i32, i32, i32
  }
  func.func @transform_15(%arg0: i32) -> (i32, i32, i32) {
    %c0_i32 = arith.constant 0 : i32
    %c0_i32_0 = arith.constant 0 : i32
    %c0_i32_1 = arith.constant 0 : i32
    return %arg0, %c0_i32, %c0_i32_0 : i32, i32, i32
  }
  func.func @transform_16(%arg0: i32) -> (i32, i32, i32) {
    %c0_i32 = arith.constant 0 : i32
    %c0_i32_0 = arith.constant 0 : i32
    %c0_i32_1 = arith.constant 0 : i32
    return %arg0, %c0_i32, %c0_i32_0 : i32, i32, i32
  }
  func.func @transform_17(%arg0: i32) -> (i32, i32, i32) {
    %c0_i32 = arith.constant 0 : i32
    %c0_i32_0 = arith.constant 0 : i32
    %c0_i32_1 = arith.constant 0 : i32
    return %arg0, %c0_i32, %c0_i32_0 : i32, i32, i32
  }
  func.func @transform_18(%arg0: i32) -> (i32, i32, i32) {
    %c0_i32 = arith.constant 0 : i32
    %c0_i32_0 = arith.constant 0 : i32
    %c0_i32_1 = arith.constant 0 : i32
    return %arg0, %c0_i32, %c0_i32_0 : i32, i32, i32
  }
  func.func @transform_19(%arg0: i32) -> (i32, i32, i32) {
    %c0_i32 = arith.constant 0 : i32
    %c0_i32_0 = arith.constant 0 : i32
    %c0_i32_1 = arith.constant 0 : i32
    return %arg0, %c0_i32, %c0_i32_0 : i32, i32, i32
  }
  func.func @transform_20(%arg0: i32) -> (i32, i32, i32) {
    %c0_i32 = arith.constant 0 : i32
    %c0_i32_0 = arith.constant 0 : i32
    %c0_i32_1 = arith.constant 0 : i32
    return %arg0, %c0_i32, %c0_i32_0 : i32, i32, i32
  }
  func.func @transform_21(%arg0: i32) -> (i32, i32, i32) {
    %c0_i32 = arith.constant 0 : i32
    %c0_i32_0 = arith.constant 0 : i32
    %c0_i32_1 = arith.constant 0 : i32
    return %arg0, %c0_i32, %c0_i32_0 : i32, i32, i32
  }
  func.func @transform_22(%arg0: i32) -> (i32, i32, i32) {
    %c0_i32 = arith.constant 0 : i32
    %c0_i32_0 = arith.constant 0 : i32
    %c0_i32_1 = arith.constant 0 : i32
    return %arg0, %c0_i32, %c0_i32_0 : i32, i32, i32
  }
  func.func @transform_23(%arg0: i32) -> (i32, i32) {
    %c0_i32 = arith.constant 0 : i32
    %c0_i32_0 = arith.constant 0 : i32
    %c0_i32_1 = arith.constant 0 : i32
    return %c0_i32, %c0_i32_0 : i32, i32
  }
}

</mosaic_0001>

<bundles_post_ra>
// kernel: tpu_custom_call.1
= control target key start
LH: loop header
LB: loop body
LE: loop exit
PB: predicated region body
PF: predicated region fallthrough
CT: control target
= control target key end

     0   :  { %s2662_s0 = inlined_call_operand.vmem [shape: f32[16,32], index: 0, kind: input, shape index: {}]   ;;  %s2663_s1 = inlined_call_operand.vmem [shape: bf16[32,16], index: 1, kind: input, shape index: {}]   ;;  %s2664_s2 = inlined_call_operand.vmem [shape: bf16[32,16], index: 2, kind: input, shape index: {}]   ;;  %s2665_s3 = inlined_call_operand.vmem [shape: bf16[16,32], index: 3, kind: input, shape index: {}]   ;;  %s2666_s4 = inlined_call_operand.vmem [shape: f32[32,8], index: 4, kind: input, shape index: {}]   ;;  %s2667_s5 = inlined_call_operand.vmem [shape: f32[32,4], index: 5, kind: input, shape index: {}]   ;;  %s2668_s6 = inlined_call_operand.vmem [shape: f32[4,32], index: 6, kind: input, shape index: {}]   ;;  %s2669_s7 = inlined_call_operand.vmem [shape: f32[2,32,96], index: 7, kind: input, shape index: {}]   ;;  %s2670_s8 = inlined_call_operand.vmem [shape: f32[2,1,96], index: 8, kind: input, shape index: {}]   ;;  %s2671_s9 = inlined_call_operand.vmem [shape: f32[2,32,32], index: 9, kind: input, shape index: {}]   ;;  %s2672_s10 = inlined_call_operand.vmem [shape: f32[2,1,32], index: 10, kind: input, shape index: {}]   ;;  %s2673_s11 = inlined_call_operand.vmem [shape: f32[2,8,8], index: 11, kind: input, shape index: {}]   ;;  %s2674_s12 = inlined_call_operand.vmem [shape: f32[2,1,8], index: 12, kind: input, shape index: {}]   ;;  %s2675_s13 = inlined_call_operand.vmem [shape: f32[2,8,4], index: 13, kind: input, shape index: {}]   ;;  %s2676_s14 = inlined_call_operand.vmem [shape: f32[2,1,4], index: 14, kind: input, shape index: {}]   ;;  %s2677_s15 = inlined_call_operand.vmem [shape: f32[2,1,32], index: 15, kind: input, shape index: {}]   ;;  %s2678_s16 = inlined_call_operand.vmem [shape: f32[2,1,32], index: 16, kind: input, shape index: {}]   ;;  %s2679_s17 = inlined_call_operand.vmem [shape: f32[2,1,32], index: 17, kind: input, shape index: {}]   ;;  %s2680_s18 = inlined_call_operand.vmem [shape: f32[2,1,32], index: 18, kind: input, shape index: {}]   ;;  %s2681_s19 = inlined_call_operand.vmem [shape: f32[2,32,64], index: 19, kind: input, shape index: {}]   ;;  %s2682_s20 = inlined_call_operand.vmem [shape: f32[2,1,64], index: 20, kind: input, shape index: {}]   ;;  %s2683_s21 = inlined_call_operand.vmem [shape: f32[2,64,32], index: 21, kind: input, shape index: {}]   ;;  %s2684_s22 = inlined_call_operand.vmem [shape: f32[2,1,32], index: 22, kind: input, shape index: {}]   ;;  %s2685_s23 = inlined_call_operand.hbm [shape: f32[16,32], index: 23, kind: output, shape index: {}]  }
   0x1   :  { %2694 = sst [smem:[#allocation9_spill]] %s2662_s0 }
   0x2   :  { %2695 = sst [smem:[#allocation10_spill]] %s2663_s1 }
   0x3   :  { %2696 = sst [smem:[#allocation11_spill]] %s2664_s2 }
   0x4   :  { %2697 = sst [smem:[#allocation12_spill]] %s2665_s3 }
   0x5   :  { %2698 = sst [smem:[#allocation13_spill]] %s2666_s4 }
   0x6   :  { %2699 = sst [smem:[#allocation14_spill]] %s2667_s5 }
   0x7   :  { %2700 = sst [smem:[#allocation15_spill]] %s2668_s6 }
   0x8   :  { %2701 = sst [smem:[#allocation16_spill]] %s2669_s7 }
   0x9   :  { %2702 = sst [smem:[#allocation17_spill]] %s2671_s9 }
   0xa   :  { %2703 = sst [smem:[#allocation18_spill]] %s2672_s10 }
   0xb   :  { %2704 = sst [smem:[#allocation19_spill]] %s2673_s11 }
   0xc   :  { %2705 = sst [smem:[#allocation20_spill]] %s2675_s13 }
   0xd   :  { %2706 = sst [smem:[#allocation21_spill]] %s2679_s17 }
   0xe   :  { %2707 = sst [smem:[#allocation22_spill]] %s2683_s21 }
   0xf   :  { %2708 = sst [smem:[#allocation23_spill]] %s2684_s22 }
  0x10   :  { %2709 = sst [smem:[#allocation24_spill]] %s2685_s23 }
  0x11   :  { %28 = vsyncpa [#allocation4], 0  ;;  %s2341_s4 = smov 0  }
  0x12 LB: > { %2710 = sst [smem:[#allocation6_spill]] %s2214_s4  ;;  %s2347_s30 = sadd.s32 4294967295, %s2214_s4   ;;  %s2214_s4 = sphi %s2341_s4, %s34_s4  }
  0x13   : > { %2711 = sst [smem:[#allocation7_spill]] %s2347_s30  ;;  %p2012_p0 = scmp.ge.s32.totalorder %s2214_s4, 1 }
  0x14   : > { %p761_p1 = scmp.lt.s32.totalorder %s2214_s4, 3 }
  0x16   : > { %p762_p2 = pnand %p2012_p0, %p761_p1 }
  0x18   : > { %765 = sbr.rel (%p762_p2) target bundleno = 2215 (0x8a7), region = 112 }
  0x1d   : > { %p873_p3 = scmp.lt.s32.totalorder %s2347_s30, 1  ;;  %s2712_s27 = sld [smem:[#allocation16_spill]] }
  0x1e   : > { %s2713_s9 = sld [smem:[#allocation17_spill]] }
  0x1f   : > { %s2353_s24 = scalar_select %p873_p3, %s2347_s30, 1 }
  0x20   : > { %s2716_s11 = sld [smem:[#allocation19_spill]] }
  0x21   : > { %s2088_s25 = sshll.u32 %s2353_s24, 5  ;;  %s2017_s30 = sshll.u32 %s2353_s24, 3 }
  0x22   : > { %s2717_s13 = sld [smem:[#allocation20_spill]]  ;;  %s922_s0 = scalar_lea.vmem %s2682_s20, %s2353_s24 }
  0x23   : > { %s877_s7 = scalar_lea.vmem %s2712_s27, %s2088_s25  ;;  %s2091_s10 = sshll.u32 %s2353_s24, 6 }
  0x24   : > { %s2366_s3 = scalar_lea.vmem %s2713_s9, %s2088_s25  ;;  %s2410_s9 = scalar_lea.vmem %s2681_s19, %s2088_s25 }
  0x25   : > { %2714 = sst [smem:[#allocation8_spill]] %s2366_s3 }
  0x26   : > { %s2376_s5 = scalar_lea.vmem %s2716_s11, %s2017_s30  ;;  %s2719_s11 = sld [smem:[#allocation23_spill]] }
  0x27   : > { %s2720_s1 = sld [smem:[#allocation22_spill]] }
  0x28   : > { %s2385_s28 = scalar_lea.vmem %s2717_s13, %s2017_s30  ;;  %s914_s30 = scalar_lea.vmem %s2680_s18, %s2353_s24 }
  0x29   : > { %s2721_s2 = sld [smem:[#allocation7_spill]] }
  0x2c   : > { %s930_s4 = scalar_lea.vmem %s2719_s11, %s2353_s24 }
  0x2d   : > { %s2424_s17 = scalar_lea.vmem %s2720_s1, %s2091_s10 }
  0x2f   : > { %p2023_p4 = scmp.ne.s32.totalorder %s2721_s2, 0 }
  0x30   : > { %s2722_s6 = sld [smem:[#allocation9_spill]] (!%p2023_p4) }
  0x31   : > { %935 = sbr.rel (%p2023_p4) target bundleno = 57 (0x39), region = 116 }
  0x36   : > { %v936_v0 = vld [vmem:[%s2722_s6] sm:$0xff]  ;;  %vm938_vm0 = vcmask 261120   ;;  %v937_v1 = vld [vmem:[%s2722_s6 + $0x8] sm:$0xff] }
  0x37   : > { %939 = vst.msk [vmem:[#allocation2] sm:$0xff] %vm938_vm0, %v936_v0 }
  0x38   : > { %940 = vst.msk [vmem:[#allocation2 + $0x8] sm:$0xff] %vm938_vm0, %v937_v1 }
  0x39 PF: > { %v961_v2 = vld [vmem:[%s877_s7 + $0x18] sm:$0xff]  ;;  %v960_v3 = vld [vmem:[%s877_s7 + $0x10] sm:$0xff]  ;;  %v959_v4 = vld [vmem:[%s877_s7 + $0x8] sm:$0xff]  ;;  %vm966_vm1 = vcmask 261120   ;;  %s2723_s1 = sld [smem:[#allocation13_spill]]  ;;  %vm1085_vm2 = vcmask 64512   ;;  %s2724_s13 = scalar_lea.vmem %s2670_s8, %s2353_s24 }
  0x3a   : > { %985 = vmatpush.msra.mxu0 %v961_v2  ;;  %v958_v5 = vld [vmem:[%s877_s7] sm:$0xff]  ;;  %s2216_s25 = smov 96   ;;  %s2725_s10 = sld [smem:[#allocation11_spill]]  ;;  %vm1007_vm3 = vcmask 130048  }
  0x3b   : > { %v1080_v8 = vld [vmem:[%s2376_s5] sm:$0xff]  ;;  %s2726_s22 = scalar_lea.vmem %s2674_s12, %s2353_s24  ;;  %s2727_s26 = sld [smem:[#allocation10_spill]] }
  0x3c   : > { %986 = vmatpush.msra.mxu0 %v960_v3  ;;  %1113 = vmatpush.msra.mxu3 %v1080_v8  ;;  %v2116_v14 = vld [vmem:[%s2724_s13] ss:$0 sm:$0xff]  ;;  %s2728_s29 = sld [smem:[#allocation14_spill]]  ;;  %s2729_s13 = scalar_lea.vmem %s2676_s14, %s2353_s24 }
  0x3d   : > { %v2117_v21 = vld [vmem:[%s2726_s22] ss:$0 sm:$0xff]  ;;  %s2730_s27 = sld [smem:[#allocation12_spill]]  ;;  %s2736_s11 = scalar_lea.vmem %s2678_s16, %s2353_s24 }
  0x3e   : > { %987 = vmatpush.msra.mxu0 %v959_v4  ;;  %v2433_v6 = vld [vmem:[#allocation2] sm:$0xff]  ;;  %s2731_s23 = sld [smem:[#allocation15_spill]] }
  0x3f   : > { %v2437_v7 = vld [vmem:[#allocation2 + $0x8] sm:$0xff]  ;;  %v1076_v9 = vld [vmem:[%s2723_s1] sm:$0xff]  ;;  %v1078_v11 = vld [vmem:[%s2723_s1 + $0x10] sm:$0xff]  ;;  %s2732_s21 = sld [smem:[#allocation8_spill]] }
  0x40   : > { %988 = vmatpush.msra.mxu0 %v958_v5  ;;  %2046 = vmatmul.msk.f32.vlgmr.msra.gmra.mxu3 %vm1085_vm2, %v1076_v9  ;;  %v1077_v10 = vld [vmem:[%s2723_s1 + $0x8] sm:$0xff]  ;;  %v1079_v13 = vld [vmem:[%s2723_s1 + $0x18] sm:$0xff]  ;;  %v2467_v19 = vld [vmem:[%s2725_s10] sm:$0xff]  ;;  %s2733_s3 = sld [smem:[#allocation18_spill]] }
  0x41   : > { %2024 = vmatmul.msk.f32.vlgmr.msra.gmra.mxu0 %vm966_vm1, %v2433_v6  ;;  %v2474_v20 = vld [vmem:[%s2725_s10 + $0x8] sm:$0xff]  ;;  %v2094_v30 = vld [vmem:[%s2727_s26] sm:$0xff]  ;;  %s2738_s5 = sld [smem:[#allocation21_spill]] }
  0x42   : > { %v1207_v40 = vld [vmem:[%s2385_s28] sm:$0xff]  ;;  %v2095_v50 = vld [vmem:[%s2727_s26 + $0x8] sm:$0xff] }
  0x43   : > { %1235 = vmatpush.msrb.mxu0 %v1207_v40 }
  0x46   : > { %s2734_s2 = scalar_lea.vmem %s2733_s3, %s2353_s24 }
  0x47   : > { %s2739_s3 = scalar_lea.vmem %s2738_s5, %s2353_s24 }
  0x48   : > { %2047 = vmatmul.msk.f32.gmra.mxu3 %vm1085_vm2, %v1077_v10 }
  0x49   : > { %2025 = vmatmul.msk.f32.gmra.mxu0 %vm966_vm1, %v2437_v7 }
  0x50   : > { %2048 = vmatmul.msk.f32.gmra.mxu3 %vm1085_vm2, %v1078_v11 }
  0x58   : > { %2049 = vmatmul.msk.f32.gmra.mxu3 %vm1085_vm2, %v1079_v13 }
  0xbe   : > { %v990_v12 = vpop.f32.mrf.mxu0 }
  0xbf   : > { %v991_v16 = vadd.f32 %v2116_v14, %v990_v12 }
  0xc3   : > { %v1115_v22 = vpop.f32.mrf.mxu3 }
  0xc4   : > { %v1116_v23 = vadd.f32 %v2117_v21, %v1115_v22 }
  0xc6   : > { %v993_v15 = vpop.f32.mrf.mxu0  ;;  %v2050_v24 = vmul.f32 -1.442695, %v1116_v23 }
  0xc7   : > { %v994_v17 = vadd.f32 %v2116_v14, %v993_v15 }
  0xc8   : > { %2126 = vpow2.f32 %v2050_v24 }
  0xc9   : > { %v996_v18 = vpack.c.bf16 %v994_v17, %v991_v16 }
  0xcb   : > { %1044 = vrot.lane.b32.xlu0 %v996_v18, %s2216_s25  ;;  %1021 = vmatpush.bf16.msra.mxu1 %v996_v18  ;;  %v1118_v25 = vpop.f32.mrf.mxu3 }
  0xcc   : > { %v2483_v26 = vadd.f32 %v2117_v21, %v1118_v25 }
  0xce   : > { %2034 = vmatmul.msk.bf16.vlgmr.msra.gmra.mxu1 %vm1007_vm3, %v2467_v19  ;;  %v2051_v27 = vmul.f32 -1.442695, %v2483_v26  ;;  %v2127_v28 = vpop.eup %2126 }
  0xcf   : > { %v1139_v31 = vadd.f32 1.0, %v2127_v28 }
  0xd0   : > { %2128 = vpow2.f32 %v2051_v27 }
  0xd1   : > { %2130 = vrcp.f32 %v1139_v31  ;;  %v1154_v39 = vand.u32 2147483648, %v1139_v31  ;;  %vm1148_vm4 = vweird.f32 %v1139_v31  ;;  %v1152_v42 = vand.u32 2147483647, %v1139_v31 }
  0xd3   : > { %v1121_v32 = vpop.f32.mrf.mxu3  ;;  %v1155_v47 = vor.u32 1.1754944e-38, %v1154_v39  ;;  %vm1153_vm7 = vcmp.eq.f32.partialorder %v1152_v42, 8.507059e+37 }
  0xd4   : > { %v2490_v33 = vadd.f32 %v2117_v21, %v1121_v32  ;;  %v954_v32 = vld [vmem:[%s2728_s29 + $0x8] sm:$0xff] }
  0xd6   : > { %v2129_v34 = vpop.eup %2128  ;;  %v2052_v35 = vmul.f32 -1.442695, %v2490_v33 }
  0xd7   : > { %v1140_v36 = vadd.f32 1.0, %v2129_v34  ;;  %v2131_v37 = vpop.eup %2130 }
  0xd8   : > { %2132 = vpow2.f32 %v2052_v35  ;;  %v1144_v38 = vmul.f32 %v2131_v37, %v1139_v31  ;;  %vm1149_vm5 = vweird.f32 %v2131_v37  ;;  %v955_v31 = vld [vmem:[%s2728_s29 + $0x10] sm:$0xff] }
  0xd9   : > { %2134 = vrcp.f32 %v1140_v36  ;;  %vm1150_vm6 = vmor %vm1148_vm4, %vm1149_vm5  ;;  %vm1163_vm8 = vweird.f32 %v1140_v36  ;;  %v1169_v55 = vand.u32 2147483648, %v1140_v36  ;;  %v1167_v58 = vand.u32 2147483647, %v1140_v36 }
  0xda   : > { %v1145_v41 = vsub.f32 1.0, %v1144_v38 }
  0xdb   : > { %v1124_v43 = vpop.f32.mrf.mxu3  ;;  %v1170_v61 = vor.u32 1.1754944e-38, %v1169_v55  ;;  %vm1168_vm11 = vcmp.eq.f32.partialorder %v1167_v58, 8.507059e+37 }
  0xdc   : > { %v2494_v44 = vadd.f32 %v2117_v21, %v1124_v43  ;;  %v1146_v45 = vmul.f32 %v2131_v37, %v1145_v41 }
  0xde   : > { %2035 = vmatmul.msk.bf16.gmra.mxu1 %vm1007_vm3, %v2474_v20  ;;  %v2133_v46 = vpop.eup %2132  ;;  %v2053_v48 = vmul.f32 -1.442695, %v2494_v44  ;;  %v1147_v51 = vadd.f32 %v2131_v37, %v1146_v45 }
  0xdf   : > { %v2135_v49 = vpop.eup %2134  ;;  %v1141_v52 = vadd.f32 1.0, %v2133_v46 }
  0xe0   : > { %v1159_v53 = vmul.f32 %v2135_v49, %v1140_v36  ;;  %2136 = vpow2.f32 %v2053_v48  ;;  %v1151_v54 = vsel %vm1150_vm6, %v2131_v37, %v1147_v51  ;;  %vm1164_vm9 = vweird.f32 %v2135_v49 }
  0xe1   : > { %2138 = vrcp.f32 %v1141_v52  ;;  %v1156_v56 = vsel %vm1153_vm7, %v1155_v47, %v1151_v54  ;;  %vm1165_vm10 = vmor %vm1163_vm8, %vm1164_vm9  ;;  %vm1178_vm12 = vweird.f32 %v1141_v52  ;;  %v1184_v5 = vand.u32 2147483648, %v1141_v52  ;;  %v2118_v54 = vld [vmem:[%s2729_s13] ss:$0 sm:$0xff]  ;;  %s2740_s13 = sld [smem:[#allocation7_spill]] }
  0xe2   : > { %v1160_v57 = vsub.f32 1.0, %v1159_v53  ;;  %v1203_v59 = vmul.f32 %v1156_v56, %v1116_v23  ;;  %v1182_v10 = vand.u32 2147483647, %v1141_v52  ;;  %vm1453_vm7 = vcmask 1043456  }
  0xe3   : > { %v1185_v12 = vor.u32 1.1754944e-38, %v1184_v5 }
  0xe4   : > { %v1161_v60 = vmul.f32 %v2135_v49, %v1160_v57  ;;  %2054 = vmatmul.msk.f32.vlgmr.msrb.gmra.mxu0 %vm1085_vm2, %v1203_v59  ;;  %vm1183_vm15 = vcmp.eq.f32.partialorder %v1182_v10, 8.507059e+37 }
  0xe6   : > { %v2137_v62 = vpop.eup %2136  ;;  %v1162_v63 = vadd.f32 %v2135_v49, %v1161_v60 }
  0xe7   : > { %v2139_v0 = vpop.eup %2138  ;;  %v1142_v1 = vadd.f32 1.0, %v2137_v62  ;;  %p2083_p5 = scmp.ne.s32.totalorder %s2740_s13, 1 }
  0xe8   : > { %v1166_v2 = vsel %vm1165_vm10, %v2135_v49, %v1162_v63  ;;  %v1174_v3 = vmul.f32 %v2139_v0, %v1141_v52  ;;  %vm1179_vm13 = vweird.f32 %v2139_v0 }
  0xe9   : > { %v1171_v4 = vsel %vm1168_vm11, %v1170_v61, %v1166_v2  ;;  %2140 = vrcp.f32 %v1142_v1  ;;  %vm1180_vm14 = vmor %vm1178_vm12, %vm1179_vm13  ;;  %vm1193_vm0 = vweird.f32 %v1142_v1  ;;  %v1199_v18 = vand.u32 2147483648, %v1142_v1 }
  0xea   : > { %v1204_v8 = vmul.f32 %v1171_v4, %v2483_v26  ;;  %v1175_v9 = vsub.f32 1.0, %v1174_v3  ;;  %v1197_v23 = vand.u32 2147483647, %v1142_v1 }
  0xeb   : > { %v1200_v25 = vor.u32 1.1754944e-38, %v1199_v18 }
  0xec   : > { %v1176_v11 = vmul.f32 %v2139_v0, %v1175_v9  ;;  %2055 = vmatmul.msk.f32.gmra.mxu0 %vm1085_vm2, %v1204_v8  ;;  %vm1198_vm6 = vcmp.eq.f32.partialorder %v1197_v23, 8.507059e+37 }
  0xee   : > { %v1177_v13 = vadd.f32 %v2139_v0, %v1176_v11 }
  0xef   : > { %v2141_v14 = vpop.eup %2140 }
  0xf0   : > { %v1181_v15 = vsel %vm1180_vm14, %v2139_v0, %v1177_v13  ;;  %v1189_v16 = vmul.f32 %v2141_v14, %v1142_v1  ;;  %vm1194_vm4 = vweird.f32 %v2141_v14 }
  0xf1   : > { %v1186_v17 = vsel %vm1183_vm15, %v1185_v12, %v1181_v15  ;;  %vm1195_vm5 = vmor %vm1193_vm0, %vm1194_vm4 }
  0xf2   : > { %v1205_v21 = vmul.f32 %v1186_v17, %v2490_v33  ;;  %v1190_v22 = vsub.f32 1.0, %v1189_v16  ;;  %v953_v33 = vld [vmem:[%s2728_s29] sm:$0xff] }
  0xf4   : > { %v1191_v24 = vmul.f32 %v2141_v14, %v1190_v22  ;;  %2056 = vmatmul.msk.f32.gmra.mxu0 %vm1085_vm2, %v1205_v21 }
  0xf6   : > { %v1192_v26 = vadd.f32 %v2141_v14, %v1191_v24 }
  0xf8   : > { %v1196_v27 = vsel %vm1195_vm5, %v2141_v14, %v1192_v26 }
  0xf9   : > { %v1201_v28 = vsel %vm1198_vm6, %v1200_v25, %v1196_v27  ;;  %v2546_v27 = vld [vmem:[%s2730_s27] sm:$0xff] }
 0x13d   : > { %v1045_v29 = vpop.permute.xlu0 %1044 }
 0x13e   : > { %1060 = vmatpush.bf16.msra.mxu2 %v1045_v29  ;;  %v1206_v29 = vmul.f32 %v1201_v28, %v2494_v44 }
 0x140   : > { %2057 = vmatmul.msk.f32.gmra.mxu0 %vm1085_vm2, %v1206_v29  ;;  %vm1298_vm2 = vcmask 31744  }
 0x141   : > { %2044 = vmatmul.msk.bf16.vlgmr.msra.gmra.mxu2 %vm1007_vm3, %v2094_v30  ;;  %v956_v30 = vld [vmem:[%s2728_s29 + $0x18] sm:$0xff] }
 0x142   : > { %1273 = vmatpush.msrb.mxu3 %v956_v30 }
 0x144   : > { %1274 = vmatpush.msrb.mxu3 %v955_v31  ;;  %v957_v31 = vld [vmem:[%s2731_s23] sm:$0xf] }
 0x146   : > { %1275 = vmatpush.msrb.mxu3 %v954_v32 }
 0x148   : > { %1276 = vmatpush.msrb.mxu3 %v953_v33 }
 0x14b   : > { %v1023_v34 = vpop.f32.mrf.mxu1 }
 0x151   : > { %2045 = vmatmul.msk.bf16.gmra.mxu2 %vm1007_vm3, %v2095_v50 }
 0x153   : > { %v1025_v37 = vpop.f32.mrf.mxu1 }
 0x15b   : > { %v1028_v40 = vpop.f32.mrf.mxu1 }
 0x161   : > { %v1237_v46 = vpop.f32.mrf.mxu0 }
 0x163   : > { %v1030_v43 = vpop.f32.mrf.mxu1 }
 0x169   : > { %v1240_v48 = vpop.f32.mrf.mxu0 }
 0x171   : > { %v1243_v50 = vpop.f32.mrf.mxu0 }
 0x1bd   : > { %v1246_v57 = vpop.f32.mrf.mxu0 }
 0x1c4   : > { %v1062_v35 = vpop.f32.mrf.mxu2 }
 0x1c5   : > { %v1072_v36 = vmul.f32 %v1062_v35, %v1023_v34 }
 0x1c7   : > { %2058 = vmatmul.msk.f32.vlgmr.msrb.gmra.mxu3 %vm966_vm1, %v1072_v36 }
 0x1cc   : > { %v1064_v38 = vpop.f32.mrf.mxu2 }
 0x1cd   : > { %v1073_v39 = vmul.f32 %v1064_v38, %v1025_v37  ;;  %1492 = vrot.lane.b32.xlu2 %v1064_v38, %s2216_s25 }
 0x1cf   : > { %2059 = vmatmul.msk.f32.gmra.mxu3 %vm966_vm1, %v1073_v39 }
 0x1d4   : > { %v1067_v41 = vpop.f32.mrf.mxu2 }
 0x1d5   : > { %v1074_v42 = vmul.f32 %v1067_v41, %v1028_v40  ;;  %1494 = vrot.lane.b32.xlu0 %v1067_v41, %s2216_s25 }
 0x1d7   : > { %2060 = vmatmul.msk.f32.gmra.mxu3 %vm966_vm1, %v1074_v42 }
 0x1dc   : > { %v1069_v44 = vpop.f32.mrf.mxu2 }
 0x1dd   : > { %v1075_v45 = vmul.f32 %v1069_v44, %v1030_v43  ;;  %1496 = vrot.lane.b32.xlu1 %v1069_v44, %s2216_s25 }
 0x1df   : > { %2061 = vmatmul.msk.f32.gmra.mxu3 %vm966_vm1, %v1075_v45 }
 0x1e5   : > { %1490 = vrot.lane.b32.xlu1 %v1062_v35, %s2216_s25  ;;  %s2735_s25 = scalar_lea.vmem %s2677_s15, %s2353_s24 }
 0x24a   : > { %v1278_v47 = vpop.f32.mrf.mxu3 }
 0x24b   : > { %v1279_v53 = vadd.f32 %v1278_v47, %v1237_v46 }
 0x24d   : > { %v1294_v59 = vadd.f32 %v2118_v54, %v1279_v53 }
 0x24f   : > { %v1299_v0 = vsel %vm1298_vm2, %v1294_v59, -inf }
 0x252   : > { %v1281_v49 = vpop.f32.mrf.mxu3 }
 0x253   : > { %v1282_v52 = vadd.f32 %v1281_v49, %v1240_v48 }
 0x255   : > { %v1295_v56 = vadd.f32 %v2118_v54, %v1282_v52 }
 0x257   : > { %v1300_v62 = vsel %vm1298_vm2, %v1295_v56, -inf }
 0x258   : > { %v1303_v3 = vmax.f32 %v1299_v0, %v1300_v62 }
 0x25a   : > { %v1284_v51 = vpop.f32.mrf.mxu3 }
 0x25b   : > { %v1285_v55 = vadd.f32 %v1284_v51, %v1243_v50 }
 0x25d   : > { %v1296_v60 = vadd.f32 %v2118_v54, %v1285_v55 }
 0x25f   : > { %v1301_v1 = vsel %vm1298_vm2, %v1296_v60, -inf }
 0x262   : > { %v1287_v58 = vpop.f32.mrf.mxu3 }
 0x263   : > { %v1288_v61 = vadd.f32 %v1287_v58, %v1246_v57 }
 0x265   : > { %v1297_v63 = vadd.f32 %v2118_v54, %v1288_v61 }
 0x267   : > { %v1302_v2 = vsel %vm1298_vm2, %v1297_v63, -inf }
 0x268   : > { %v1304_v4 = vmax.f32 %v1301_v1, %v1302_v2 }
 0x26a   : > { %v1305_v5 = vmax.f32 %v1303_v3, %v1304_v4 }
 0x26c   : > { %v1306_v8 = vrot.slane %v1305_v5, 4 }
 0x26e   : > { %v1307_v9 = vmax.f32 %v1305_v5, %v1306_v8 }
 0x270   : > { %v1308_v10 = vrot.slane %v1307_v9, 2 }
 0x272   : > { %v1309_v11 = vmax.f32 %v1307_v9, %v1308_v10 }
 0x274   : > { %v1310_v12 = vrot.slane %v1309_v11, 1 }
 0x276   : > { %v1311_v13 = vmax.f32 %v1309_v11, %v1310_v12 }
 0x278   : > { %v1315_v14 = vsub.f32 %v1297_v63, %v1311_v13  ;;  %v1314_v15 = vsub.f32 %v1296_v60, %v1311_v13  ;;  %v1313_v16 = vsub.f32 %v1295_v56, %v1311_v13  ;;  %v1312_v21 = vsub.f32 %v1294_v59, %v1311_v13 }
 0x27a   : > { %v1322_v17 = vmul.f32 1.442695, %v1315_v14  ;;  %v1320_v18 = vmul.f32 1.442695, %v1314_v15  ;;  %v1318_v22 = vmul.f32 1.442695, %v1313_v16 }
 0x27b   : > { %v1316_v23 = vmul.f32 1.442695, %v1312_v21 }
 0x27c   : > { %2142 = vpow2.f32 %v1322_v17 }
 0x27d   : > { %2144 = vpow2.f32 %v1320_v18 }
 0x27e   : > { %2146 = vpow2.f32 %v1318_v22 }
 0x27f   : > { %2148 = vpow2.f32 %v1316_v23  ;;  %v1525_v23 = vld [vmem:[%s2732_s21 + $0x18] sm:$0xff] }
 0x280   : > { %1548 = vmatpush.msra.mxu3 %v1525_v23 }
 0x282   : > { %v2537_v24 = vpop.eup %2142 }
 0x283   : > { %1344 = vmatpush.msrb.mxu1 %v2537_v24  ;;  %v2540_v25 = vpop.eup %2144 }
 0x284   : > { %v2147_v26 = vpop.eup %2146 }
 0x285   : > { %1345 = vmatpush.msrb.mxu1 %v2540_v25  ;;  %v2149_v28 = vpop.eup %2148 }
 0x287   : > { %1346 = vmatpush.msrb.mxu1 %v2147_v26 }
 0x289   : > { %1347 = vmatpush.msrb.mxu1 %v2149_v28 }
 0x28a   : > { %2066 = vmatmul.msk.bf16.vlgmr.msrb.gmra.mxu1 %vm966_vm1, %v2546_v27 }
 0x28b   : > { %2069 = vmatpush.msk.msra.mxu1 %vm1453_vm7, %v957_v31  ;;  %v1495_v31 = vpop.permute.xlu0 %1494 }
 0x307   : > { %v1349_v29 = vpop.f32.mrf.mxu1 }
 0x30f   : > { %v1351_v30 = vpop.f32.mrf.mxu1 }
 0x310   : > { %1368 = vmatpush.msrb.mxu2 %v1351_v30  ;;  %v1497_v30 = vpop.permute.xlu1 %1496 }
 0x312   : > { %1369 = vmatpush.msrb.mxu2 %v1349_v29 }
 0x313   : > { %2067 = vmatmul.msk.bf16.vlgmr.msrb.gmra.mxu2 %vm1007_vm3, %v2467_v19 }
 0x323   : > { %2068 = vmatmul.msk.bf16.gmra.mxu2 %vm1007_vm3, %v2474_v20 }
 0x396   : > { %v1371_v32 = vpop.f32.mrf.mxu2 }
 0x397   : > { %v1372_v33 = vadd.f32 1e-12, %v1371_v32 }
 0x399   : > { %2150 = vrcp.f32 %v1372_v33  ;;  %v1392_v39 = vand.u32 2147483648, %v1372_v33  ;;  %v1390_v40 = vand.u32 2147483647, %v1372_v33  ;;  %vm1386_vm3 = vweird.f32 %v1372_v33 }
 0x39b   : > { %v1393_v43 = vor.u32 1.1754944e-38, %v1392_v39  ;;  %vm1391_vm10 = vcmp.eq.f32.partialorder %v1390_v40, 8.507059e+37 }
 0x39e   : > { %v1373_v34 = vpop.f32.mrf.mxu2 }
 0x39f   : > { %v2151_v35 = vpop.eup %2150  ;;  %v1374_v36 = vadd.f32 1e-12, %v1373_v34 }
 0x3a0   : > { %v1382_v37 = vmul.f32 %v2151_v35, %v1372_v33  ;;  %vm1387_vm8 = vweird.f32 %v2151_v35 }
 0x3a1   : > { %2152 = vrcp.f32 %v1374_v36  ;;  %vm1388_vm9 = vmor %vm1386_vm3, %vm1387_vm8  ;;  %v1407_v50 = vand.u32 2147483648, %v1374_v36  ;;  %v1405_v52 = vand.u32 2147483647, %v1374_v36  ;;  %vm1401_vm12 = vweird.f32 %v1374_v36 }
 0x3a2   : > { %v1383_v38 = vsub.f32 1.0, %v1382_v37  ;;  %v1491_v37 = vpop.permute.xlu1 %1490 }
 0x3a3   : > { %v1408_v57 = vor.u32 1.1754944e-38, %v1407_v50  ;;  %vm1406_vm14 = vcmp.eq.f32.partialorder %v1405_v52, 8.507059e+37 }
 0x3a4   : > { %v1384_v19 = vmul.f32 %v2151_v35, %v1383_v38 }
 0x3a6   : > { %v1385_v20 = vadd.f32 %v2151_v35, %v1384_v19  ;;  %v1376_v41 = vpop.f32.mrf.mxu2  ;;  %v1522_v19 = vld [vmem:[%s2732_s21] sm:$0xff] }
 0x3a7   : > { %v2153_v42 = vpop.eup %2152  ;;  %v1377_v44 = vadd.f32 1e-12, %v1376_v41  ;;  %v2119_v41 = vld [vmem:[%s2734_s2] ss:$0 sm:$0xff] }
 0x3a8   : > { %v1397_v45 = vmul.f32 %v2153_v42, %v1374_v36  ;;  %v1389_v46 = vsel %vm1388_vm9, %v2151_v35, %v1385_v20  ;;  %vm1402_vm11 = vweird.f32 %v2153_v42  ;;  %v1493_v35 = vpop.permute.xlu2 %1492 }
 0x3a9   : > { %2154 = vrcp.f32 %v1377_v44  ;;  %v1394_v47 = vsel %vm1391_vm10, %v1393_v43, %v1389_v46  ;;  %vm1403_vm13 = vmor %vm1401_vm12, %vm1402_vm11  ;;  %v1422_v63 = vand.u32 2147483648, %v1377_v44  ;;  %v1420_v1 = vand.u32 2147483647, %v1377_v44 }
 0x3aa   : > { %v1398_v48 = vsub.f32 1.0, %v1397_v45  ;;  %v1395_v49 = vmul.f32 %v2149_v28, %v1394_v47  ;;  %vm1416_vm0 = vweird.f32 %v1377_v44 }
 0x3ab   : > { %v1423_v4 = vor.u32 1.1754944e-38, %v1422_v63  ;;  %vm1421_vm5 = vcmp.eq.f32.partialorder %v1420_v1, 8.507059e+37  ;;  %v1626_v1 = vld [vmem:[%s2410_s9 + $0x10] sm:$0xff] }
 0x3ac   : > { %2070 = vmatmul.msk.f32.vlgmr.msra.gmra.mxu1 %vm1298_vm2, %v1395_v49  ;;  %v1399_v51 = vmul.f32 %v2153_v42, %v1398_v48  ;;  %v2217_v49 = vmov 32.0  }
 0x3ae   : > { %v1378_v53 = vpop.f32.mrf.mxu2  ;;  %v1400_v54 = vadd.f32 %v2153_v42, %v1399_v51 }
 0x3af   : > { %v2155_v55 = vpop.eup %2154  ;;  %v1379_v56 = vadd.f32 1e-12, %v1378_v53 }
 0x3b0   : > { %v1412_v58 = vmul.f32 %v2155_v55, %v1377_v44  ;;  %v1404_v59 = vsel %vm1403_vm13, %v2153_v42, %v1400_v54  ;;  %vm1417_vm15 = vweird.f32 %v2155_v55 }
 0x3b1   : > { %2156 = vrcp.f32 %v1379_v56  ;;  %v1409_v60 = vsel %vm1406_vm14, %v1408_v57, %v1404_v59  ;;  %vm1418_vm4 = vmor %vm1416_vm0, %vm1417_vm15  ;;  %v1437_v12 = vand.u32 2147483648, %v1379_v56  ;;  %v1435_v14 = vand.u32 2147483647, %v1379_v56 }
 0x3b2   : > { %v1413_v61 = vsub.f32 1.0, %v1412_v58  ;;  %v1410_v62 = vmul.f32 %v2147_v26, %v1409_v60  ;;  %vm1431_vm7 = vweird.f32 %v1379_v56  ;;  %v1523_v26 = vld [vmem:[%s2732_s21 + $0x8] sm:$0xff]  ;;  %2158 = vrcp.f32 %v2217_v49 }
 0x3b3   : > { %v1438_v16 = vor.u32 1.1754944e-38, %v1437_v12  ;;  %vm1436_vm3 = vcmp.eq.f32.partialorder %v1435_v14, 8.507059e+37 }
 0x3b4   : > { %2071 = vmatmul.msk.f32.gmra.mxu1 %vm1298_vm2, %v1410_v62  ;;  %v1414_v0 = vmul.f32 %v2155_v55, %v1413_v61 }
 0x3b6   : > { %v1415_v2 = vadd.f32 %v2155_v55, %v1414_v0  ;;  %v1627_v0 = vld [vmem:[%s2410_s9 + $0x18] sm:$0xff] }
 0x3b7   : > { %v2157_v3 = vpop.eup %2156  ;;  %1650 = vmatpush.msra.mxu2 %v1627_v0 }
 0x3b8   : > { %v1427_v5 = vmul.f32 %v2157_v3, %v1379_v56  ;;  %v1419_v8 = vsel %vm1418_vm4, %v2155_v55, %v1415_v2  ;;  %vm1432_vm6 = vweird.f32 %v2157_v3  ;;  %v2159_v50 = vpop.eup %2158  ;;  %v1625_v2 = vld [vmem:[%s2410_s9 + $0x8] sm:$0xff] }
 0x3b9   : > { %v1424_v9 = vsel %vm1421_vm5, %v1423_v4, %v1419_v8  ;;  %vm1433_vm8 = vmor %vm1431_vm7, %vm1432_vm6  ;;  %v1568_v51 = vmul.f32 32.0, %v2159_v50  ;;  %1651 = vmatpush.msra.mxu2 %v1626_v1  ;;  %vm1713_vm6 = vcmask 523264  }
 0x3ba   : > { %v1428_v10 = vsub.f32 1.0, %v1427_v5  ;;  %v1425_v11 = vmul.f32 %v2540_v25, %v1424_v9  ;;  %v1524_v25 = vld [vmem:[%s2732_s21 + $0x10] sm:$0xff] }
 0x3bb   : > { %1549 = vmatpush.msra.mxu3 %v1524_v25  ;;  %v1569_v52 = vsub.f32 1.0, %v1568_v51  ;;  %1652 = vmatpush.msra.mxu2 %v1625_v2 }
 0x3bc   : > { %2072 = vmatmul.msk.f32.gmra.mxu1 %vm1298_vm2, %v1425_v11  ;;  %v1429_v13 = vmul.f32 %v2157_v3, %v1428_v10 }
 0x3bd   : > { %1550 = vmatpush.msra.mxu3 %v1523_v26  ;;  %v1570_v53 = vmul.f32 %v2159_v50, %v1569_v52 }
 0x3be   : > { %v1430_v15 = vadd.f32 %v2157_v3, %v1429_v13 }
 0x3bf   : > { %1551 = vmatpush.msra.mxu3 %v1522_v19  ;;  %v1571_v54 = vadd.f32 %v2159_v50, %v1570_v53  ;;  %v1705_v19 = vld [vmem:[%s2424_s17 + $0x20] sm:$0xff] }
 0x3c0   : > { %v1434_v17 = vsel %vm1433_vm8, %v2157_v3, %v1430_v15  ;;  %v1624_v3 = vld [vmem:[%s2410_s9] sm:$0xff] }
 0x3c1   : > { %v1439_v18 = vsel %vm1436_vm3, %v1438_v16, %v1434_v17  ;;  %1653 = vmatpush.msra.mxu2 %v1624_v3 }
 0x3c2   : > { %v1440_v21 = vmul.f32 %v2537_v24, %v1439_v18 }
 0x3c4   : > { %2073 = vmatmul.msk.f32.gmra.mxu1 %vm1298_vm2, %v1440_v21  ;;  %vm1572_vm2 = vweird.f32 %v2159_v50 }
 0x429   : > { %v1474_v22 = vpop.f32.mrf.mxu1 }
 0x42a   : > { %v1502_v38 = vmul.f32 %v1491_v37, %v1474_v22  ;;  %v2120_v22 = vld [vmem:[%s2735_s25] ss:$0 sm:$0xff]  ;;  %v1708_v37 = vld [vmem:[%s2424_s17 + $0x38] sm:$0xff] }
 0x431   : > { %v1477_v28 = vpop.f32.mrf.mxu1 }
 0x432   : > { %v1503_v24 = vmul.f32 %v1493_v35, %v1477_v28  ;;  %v2121_v28 = vld [vmem:[%s2736_s11] ss:$0 sm:$0xff] }
 0x434   : > { %v1506_v39 = vpack.c.bf16 %v1503_v24, %v1502_v38  ;;  %v1707_v38 = vld [vmem:[%s2424_s17 + $0x30] sm:$0xff] }
 0x439   : > { %v1480_v29 = vpop.f32.mrf.mxu1 }
 0x43a   : > { %v1504_v33 = vmul.f32 %v1495_v31, %v1480_v29 }
 0x441   : > { %v1483_v32 = vpop.f32.mrf.mxu1 }
 0x442   : > { %v1505_v34 = vmul.f32 %v1497_v30, %v1483_v32 }
 0x444   : > { %v1507_v36 = vpack.c.bf16 %v1505_v34, %v1504_v33 }
 0x446   : > { %1514 = vmatpush.bf16.msra.mxu0 %v1507_v36 }
 0x44a   : > { %1515 = vmatpush.bf16.msra.mxu0 %v1506_v39  ;;  %v1706_v39 = vld [vmem:[%s2424_s17 + $0x28] sm:$0xff] }
 0x44d   : > { %2074 = vmatmul.msk.bf16.vlgmr.msra.gmra.mxu0 %vm966_vm1, %v2546_v27 }
 0x44e   : > { %1728 = vmatpush.msrb.mxu0 %v1708_v37 }
 0x450   : > { %1729 = vmatpush.msrb.mxu0 %v1707_v38 }
 0x452   : > { %1730 = vmatpush.msrb.mxu0 %v1706_v39 }
 0x454   : > { %1731 = vmatpush.msrb.mxu0 %v1705_v19 }
 0x4ca   : > { %v1517_v40 = vpop.f32.mrf.mxu0 }
 0x4cb   : > { %2075 = vmatmul.msk.f32.vlgmr.msra.gmra.mxu3 %vm966_vm1, %v1517_v40  ;;  %v1704_v40 = vld [vmem:[%s2424_s17 + $0x18] sm:$0xff] }
 0x4cc   : > { %1732 = vmatpush.msrb.mxu0 %v1704_v40 }
 0x4d2   : > { %v1519_v20 = vpop.f32.mrf.mxu0 }
 0x4d3   : > { %2076 = vmatmul.msk.f32.gmra.mxu3 %vm966_vm1, %v1519_v20  ;;  %v2122_v20 = vld [vmem:[%s922_s0] ss:$0 sm:$0xff] }
 0x54e   : > { %v1553_v42 = vpop.f32.mrf.mxu3 }
 0x54f   : > { %v1554_v43 = vadd.f32 %v2119_v41, %v1553_v42 }
 0x551   : > { %v1559_v44 = vadd.f32 %v1554_v43, %v2433_v6  ;;  %v2580_v6 = vsel %vm1572_vm2, %v2159_v50, %v1571_v54  ;;  %v1702_v43 = vld [vmem:[%s2424_s17 + $0x8] sm:$0xff] }
 0x553   : > { %v1561_v45 = vsel %vm966_vm1, %v1559_v44, 0.0 }
 0x554   : > { %1562 = vadd.xlane.f32.xlu2 %v1561_v45  ;;  %v1701_v45 = vld [vmem:[%s2424_s17] sm:$0xff] }
 0x556   : > { %v1556_v27 = vpop.f32.mrf.mxu3 }
 0x557   : > { %v1557_v46 = vadd.f32 %v2119_v41, %v1556_v27  ;;  %v1703_v41 = vld [vmem:[%s2424_s17 + $0x10] sm:$0xff] }
 0x558   : > { %1733 = vmatpush.msrb.mxu0 %v1703_v41 }
 0x559   : > { %v1560_v47 = vadd.f32 %v1557_v46, %v2437_v7 }
 0x55a   : > { %1734 = vmatpush.msrb.mxu0 %v1702_v43 }
 0x55b   : > { %v1564_v48 = vsel %vm966_vm1, %v1560_v47, 0.0 }
 0x55c   : > { %1565 = vadd.xlane.f32.xlu0 %v1564_v48  ;;  %1735 = vmatpush.msrb.mxu0 %v1701_v45 }
 0x5c7   : > { %v1563_v55 = vpop.xlane.xlu2 %1562 }
 0x5c8   : > { %v1574_v56 = vmul.f32 %v2580_v6, %v1563_v55 }
 0x5ca   : > { %v1576_v7 = vsub.f32 %v1559_v44, %v1574_v56 }
 0x5cc   : > { %v1578_v57 = vmul.f32 %v1576_v7, %v1576_v7 }
 0x5ce   : > { %v1580_v58 = vsel %vm966_vm1, %v1578_v57, 0.0 }
 0x5cf   : > { %1581 = vadd.xlane.f32.xlu1 %v1580_v58  ;;  %v1566_v59 = vpop.xlane.xlu0 %1565 }
 0x5d0   : > { %v1575_v60 = vmul.f32 %v2580_v6, %v1566_v59 }
 0x5d2   : > { %v1577_v61 = vsub.f32 %v1560_v47, %v1575_v60 }
 0x5d4   : > { %v1579_v62 = vmul.f32 %v1577_v61, %v1577_v61 }
 0x5d6   : > { %v1583_v63 = vsel %vm966_vm1, %v1579_v62, 0.0 }
 0x5d7   : > { %1584 = vadd.xlane.f32.xlu2 %v1583_v63 }
 0x642   : > { %v1582_v4 = vpop.xlane.xlu1 %1581 }
 0x643   : > { %v1586_v5 = vmul.f32 %v1582_v4, %v2580_v6 }
 0x645   : > { %v1588_v8 = vadd.f32 1e-05, %v1586_v5 }
 0x647   : > { %2160 = vrsqrt.f32 %v1588_v8  ;;  %vm1596_vm10 = vweird.f32 %v1588_v8 }
 0x64a   : > { %v1585_v9 = vpop.xlane.xlu2 %1584 }
 0x64b   : > { %v1587_v10 = vmul.f32 %v1585_v9, %v2580_v6 }
 0x64d   : > { %v2161_v11 = vpop.eup %2160  ;;  %v1589_v12 = vadd.f32 1e-05, %v1587_v10 }
 0x64e   : > { %v1591_v13 = vmul.f32 %v2161_v11, %v1588_v8  ;;  %vm1597_vm9 = vweird.f32 %v2161_v11 }
 0x64f   : > { %2162 = vrsqrt.f32 %v1589_v12  ;;  %vm1598_vm11 = vmor %vm1596_vm10, %vm1597_vm9  ;;  %vm1606_vm13 = vweird.f32 %v1589_v12 }
 0x650   : > { %v1592_v14 = vmul.f32 %v2161_v11, %v1591_v13 }
 0x652   : > { %v1593_v15 = vmul.f32 0.5, %v1592_v14 }
 0x654   : > { %v1594_v16 = vsub.f32 1.5, %v1593_v15 }
 0x655   : > { %v2163_v17 = vpop.eup %2162 }
 0x656   : > { %v1595_v18 = vmul.f32 %v2161_v11, %v1594_v16  ;;  %v1601_v21 = vmul.f32 %v2163_v17, %v1589_v12  ;;  %vm1607_vm12 = vweird.f32 %v2163_v17  ;;  %v2123_v12 = vld [vmem:[%s930_s4] ss:$0 sm:$0xff] }
 0x657   : > { %vm1608_vm14 = vmor %vm1606_vm13, %vm1607_vm12 }
 0x658   : > { %v1599_v23 = vsel %vm1598_vm11, %v2161_v11, %v1595_v18  ;;  %v1602_v25 = vmul.f32 %v2163_v17, %v1601_v21 }
 0x659   : > { %v1610_v26 = vmul.f32 %v1599_v23, %v1576_v7 }
 0x65a   : > { %v1603_v29 = vmul.f32 0.5, %v1602_v25 }
 0x65b   : > { %v1616_v30 = vmul.f32 %v2120_v22, %v1610_v26 }
 0x65c   : > { %v1604_v31 = vsub.f32 1.5, %v1603_v29 }
 0x65d   : > { %v2602_v32 = vadd.f32 %v2121_v28, %v1616_v30 }
 0x65e   : > { %v1605_v33 = vmul.f32 %v2163_v17, %v1604_v31 }
 0x65f   : > { %2077 = vmatmul.msk.f32.vlgmr.msra.gmra.mxu2 %vm966_vm1, %v2602_v32 }
 0x660   : > { %v1609_v34 = vsel %vm1608_vm14, %v2163_v17, %v1605_v33 }
 0x661   : > { %v1611_v35 = vmul.f32 %v1609_v34, %v1577_v61 }
 0x663   : > { %v1617_v24 = vmul.f32 %v2120_v22, %v1611_v35 }
 0x665   : > { %v2606_v36 = vadd.f32 %v2121_v28, %v1617_v24 }
 0x667   : > { %2078 = vmatmul.msk.f32.gmra.mxu2 %vm966_vm1, %v2606_v36 }
 0x6e2   : > { %v1655_v42 = vpop.f32.mrf.mxu2 }
 0x6e3   : > { %v1656_v44 = vadd.f32 %v2122_v20, %v1655_v42 }
 0x6e5   : > { %v2079_v27 = vmul.f32 -1.442695, %v1656_v44 }
 0x6e7   : > { %2164 = vpow2.f32 %v2079_v27  ;;  %v2124_v27 = vld [vmem:[%s2739_s3] ss:$0 sm:$0xff] }
 0x6ea   : > { %v1658_v46 = vpop.f32.mrf.mxu2 }
 0x6eb   : > { %v1659_v47 = vadd.f32 %v2122_v20, %v1658_v46 }
 0x6ed   : > { %v2165_v48 = vpop.eup %2164  ;;  %v2080_v49 = vmul.f32 -1.442695, %v1659_v47 }
 0x6ee   : > { %v1667_v50 = vadd.f32 1.0, %v2165_v48 }
 0x6ef   : > { %2166 = vpow2.f32 %v2080_v49 }
 0x6f0   : > { %2168 = vrcp.f32 %v1667_v50  ;;  %v1680_v56 = vand.u32 2147483648, %v1667_v50  ;;  %v1678_v57 = vand.u32 2147483647, %v1667_v50  ;;  %vm1674_vm0 = vweird.f32 %v1667_v50 }
 0x6f2   : > { %v1681_v60 = vor.u32 1.1754944e-38, %v1680_v56  ;;  %vm1679_vm5 = vcmp.eq.f32.partialorder %v1678_v57, 8.507059e+37 }
 0x6f5   : > { %v2167_v51 = vpop.eup %2166 }
 0x6f6   : > { %v2169_v52 = vpop.eup %2168  ;;  %v1668_v53 = vadd.f32 1.0, %v2167_v51 }
 0x6f7   : > { %v1670_v54 = vmul.f32 %v2169_v52, %v1667_v50  ;;  %vm1675_vm15 = vweird.f32 %v2169_v52 }
 0x6f8   : > { %2170 = vrcp.f32 %v1668_v53  ;;  %vm1676_vm4 = vmor %vm1674_vm0, %vm1675_vm15  ;;  %v1695_v2 = vand.u32 2147483648, %v1668_v53  ;;  %v1693_v4 = vand.u32 2147483647, %v1668_v53  ;;  %vm1689_vm8 = vweird.f32 %v1668_v53 }
 0x6f9   : > { %v1671_v55 = vsub.f32 1.0, %v1670_v54 }
 0x6fa   : > { %v1696_v8 = vor.u32 1.1754944e-38, %v1695_v2  ;;  %vm1694_vm2 = vcmp.eq.f32.partialorder %v1693_v4, 8.507059e+37 }
 0x6fb   : > { %v1672_v7 = vmul.f32 %v2169_v52, %v1671_v55 }
 0x6fd   : > { %v1673_v58 = vadd.f32 %v2169_v52, %v1672_v7 }
 0x6fe   : > { %v2171_v59 = vpop.eup %2170 }
 0x6ff   : > { %v1677_v61 = vsel %vm1676_vm4, %v2169_v52, %v1673_v58  ;;  %v1685_v62 = vmul.f32 %v2171_v59, %v1668_v53  ;;  %vm1690_vm7 = vweird.f32 %v2171_v59 }
 0x700   : > { %v1682_v63 = vsel %vm1679_vm5, %v1681_v60, %v1677_v61  ;;  %vm1691_vm3 = vmor %vm1689_vm8, %vm1690_vm7 }
 0x701   : > { %v1699_v0 = vmul.f32 %v1682_v63, %v1656_v44  ;;  %v1686_v1 = vsub.f32 1.0, %v1685_v62 }
 0x703   : > { %v1687_v3 = vmul.f32 %v2171_v59, %v1686_v1  ;;  %2081 = vmatmul.msk.f32.vlgmr.msrb.gmra.mxu0 %vm1713_vm6, %v1699_v0 }
 0x705   : > { %v1688_v5 = vadd.f32 %v2171_v59, %v1687_v3 }
 0x707   : > { %v1692_v9 = vsel %vm1691_vm3, %v2171_v59, %v1688_v5 }
 0x708   : > { %v1697_v10 = vsel %vm1694_vm2, %v1696_v8, %v1692_v9 }
 0x709   : > { %v1700_v11 = vmul.f32 %v1697_v10, %v1659_v47  ;;  %v2125_v47 = vld [vmem:[%s914_s30] ss:$0 sm:$0xff] }
 0x70b   : > { %2082 = vmatmul.msk.f32.gmra.mxu0 %vm1713_vm6, %v1700_v11 }
 0x780   : > { %v1737_v13 = vpop.f32.mrf.mxu0 }
 0x781   : > { %v1738_v14 = vadd.f32 %v2123_v12, %v1737_v13 }
 0x783   : > { %v1743_v15 = vadd.f32 %v1738_v14, %v2602_v32 }
 0x785   : > { %v1745_v16 = vsel %vm966_vm1, %v1743_v15, 0.0 }
 0x786   : > { %1746 = vadd.xlane.f32.xlu2 %v1745_v16 }
 0x788   : > { %v1740_v17 = vpop.f32.mrf.mxu0 }
 0x789   : > { %v1741_v18 = vadd.f32 %v2123_v12, %v1740_v17 }
 0x78b   : > { %v1744_v21 = vadd.f32 %v1741_v18, %v2606_v36 }
 0x78d   : > { %v1748_v22 = vsel %vm966_vm1, %v1744_v21, 0.0 }
 0x78e   : > { %1749 = vadd.xlane.f32.xlu0 %v1748_v22 }
 0x7f9   : > { %v1747_v23 = vpop.xlane.xlu2 %1746 }
 0x7fa   : > { %v1751_v25 = vmul.f32 %v1747_v23, %v2580_v6 }
 0x7fc   : > { %v1753_v26 = vsub.f32 %v1743_v15, %v1751_v25 }
 0x7fe   : > { %v1755_v28 = vmul.f32 %v1753_v26, %v1753_v26 }
 0x800   : > { %v1757_v29 = vsel %vm966_vm1, %v1755_v28, 0.0 }
 0x801   : > { %v1750_v30 = vpop.xlane.xlu0 %1749  ;;  %1758 = vadd.xlane.f32.xlu1 %v1757_v29 }
 0x802   : > { %v1752_v31 = vmul.f32 %v1750_v30, %v2580_v6 }
 0x804   : > { %v1754_v32 = vsub.f32 %v1744_v21, %v1752_v31 }
 0x806   : > { %v1756_v33 = vmul.f32 %v1754_v32, %v1754_v32 }
 0x808   : > { %v1760_v34 = vsel %vm966_vm1, %v1756_v33, 0.0 }
 0x809   : > { %1761 = vadd.xlane.f32.xlu2 %v1760_v34 }
 0x874   : > { %v1759_v35 = vpop.xlane.xlu1 %1758 }
 0x875   : > { %v1763_v24 = vmul.f32 %v1759_v35, %v2580_v6 }
 0x877   : > { %v1765_v36 = vadd.f32 1e-05, %v1763_v24 }
 0x879   : > { %2172 = vrsqrt.f32 %v1765_v36  ;;  %vm1773_vm10 = vweird.f32 %v1765_v36 }
 0x87c   : > { %v1762_v37 = vpop.xlane.xlu2 %1761 }
 0x87d   : > { %v1764_v38 = vmul.f32 %v1762_v37, %v2580_v6 }
 0x87f   : > { %v2173_v39 = vpop.eup %2172  ;;  %v1766_v19 = vadd.f32 1e-05, %v1764_v38 }
 0x880   : > { %v1768_v40 = vmul.f32 %v2173_v39, %v1765_v36  ;;  %vm1774_vm9 = vweird.f32 %v2173_v39 }
 0x881   : > { %2174 = vrsqrt.f32 %v1766_v19  ;;  %vm1775_vm11 = vmor %vm1773_vm10, %vm1774_vm9  ;;  %vm1783_vm13 = vweird.f32 %v1766_v19 }
 0x882   : > { %v1769_v20 = vmul.f32 %v2173_v39, %v1768_v40 }
 0x884   : > { %v1770_v41 = vmul.f32 0.5, %v1769_v20 }
 0x886   : > { %v1771_v42 = vsub.f32 1.5, %v1770_v41 }
 0x887   : > { %v2175_v43 = vpop.eup %2174 }
 0x888   : > { %v1772_v44 = vmul.f32 %v2173_v39, %v1771_v42  ;;  %v1778_v45 = vmul.f32 %v2175_v43, %v1766_v19  ;;  %vm1784_vm12 = vweird.f32 %v2175_v43 }
 0x889   : > { %vm1785_vm14 = vmor %vm1783_vm13, %vm1784_vm12 }
 0x88a   : > { %v1776_v6 = vsel %vm1775_vm11, %v2173_v39, %v1772_v44  ;;  %v1779_v46 = vmul.f32 %v2175_v43, %v1778_v45 }
 0x88b   : > { %v1787_v48 = vmul.f32 %v1776_v6, %v1753_v26 }
 0x88c   : > { %v1780_v49 = vmul.f32 0.5, %v1779_v46 }
 0x88d   : > { %v1793_v50 = vmul.f32 %v2124_v27, %v1787_v48 }
 0x88e   : > { %v1781_v51 = vsub.f32 1.5, %v1780_v49 }
 0x88f   : > { %v1799_v52 = vadd.f32 %v2125_v47, %v1793_v50 }
 0x890   : > { %v1782_v53 = vmul.f32 %v2175_v43, %v1781_v51 }
 0x891   : > { %1801 = vst.msk [vmem:[#allocation2] sm:$0xff] %vm966_vm1, %v1799_v52 }
 0x892   : > { %v1786_v54 = vsel %vm1785_vm14, %v2175_v43, %v1782_v53 }
 0x893   : > { %v1788_v55 = vmul.f32 %v1786_v54, %v1754_v32 }
 0x895   : > { %v1794_v56 = vmul.f32 %v2124_v27, %v1788_v55  ;;  %1806 = sbr.rel (%p2083_p5) target bundleno = 2204 (0x89c), region = 120 }
 0x897   : > { %v1800_v7 = vadd.f32 %v2125_v47, %v1794_v56 }
 0x899   : > { %1802 = vst.msk [vmem:[#allocation2 + $0x8] sm:$0xff] %vm966_vm1, %v1800_v7 }
 0x89a   : > { %1807 = vst.msk [vmem:[#allocation3] sm:$0xff] %vm966_vm1, %v1799_v52 }
 0x89b   : > { %1808 = vst.msk [vmem:[#allocation3 + $0x8] sm:$0xff] %vm966_vm1, %v1800_v7 }
 0x89c PF: > { %s2741_s24 = sld [smem:[#allocation7_spill]]  ;;  %s2218_s30 = smov [#allocation3]  }
 0x89d   : > { %s1814_s25 = sshll.u32 %s2218_s30, 4  ;;  %s2742_s11 = sld [smem:[#allocation24_spill]]  ;;  %s1815_s25 = int_to_ptr.vmem [resolvable:$true] %s1814_s25 }
 0x89e   : > { %s2219_s23 = smov 128   ;;  %s2220_s17 = smov 8  }
 0x8a2   : > { %p2101_p6 = scmp.eq.s32.totalorder %s2741_s24, 1 }
 0x8a3   : > { %s1816_s7 = sshll.u32 %s2742_s11, 4  ;;  %s1817_s7 = int_to_ptr.hbm [resolvable:$true] %s1816_s7 }
 0x8a4   : > { %2098 = dma.vmem_to_hbm [thread:$0]  (%p2101_p6), %s1815_s25, 256, %s1817_s7, [#allocation4], %s2219_s23, %s2219_s23, %s2220_s17  }
 0x8a5   : > { %2209 = dma.done.wait (%p2101_p6), [#allocation4], 256  }
 0x8a6   : > { %2211 = vsyncadd (%p2101_p6), [#allocation4], 4294967040 }
 0x8a7 PF: > { %s2743_s0 = sld [smem:[#allocation6_spill]] }
 0x8ad   : > { %s34_s4 = sadd.s32 1, %s2743_s0  }
 0x8ae   : > { %p31_p7 = scmp.ge.s32.totalorder %s34_s4, 4  }
 0x8b0   :  { %33 = sbr.rel (!%p31_p7) target bundleno = 18 (0x12), region = 192 }
 0x8b5   :  { %1833 = vsyncpa [#allocation4], 1 }
 0x8b6   :  { %1835 = vsyncpa [#allocation4 + $0x1], 1 }

</bundles_post_ra>
